<compile_context>
chip_gen: v6e
topology: v6e:2x2x1
jax: 0.10.0
libtpu: 0.0.40
codegen_flags: <defaults>
</compile_context>

<pallas_src>
import functools

import jax
import jax.numpy as jnp
from jax.experimental import pallas as pl
from jax.experimental.pallas import tpu as pltpu

HIDDEN = 256


def critic_kernel(s_ref, a_ref, w1s_ref, w1a_ref, b1_ref, w2_ref, b2_ref,
                  w3_ref, b3_ref, out_ref):
    cd = w2_ref.dtype  # compute dtype for MXU inputs (f32 or bf16)

    # Layer 1: fused concat -> state @ W1[:Ds] + action @ W1[Ds:] + b1, ReLU.
    h1 = jnp.dot(s_ref[...], w1s_ref[...], preferred_element_type=jnp.float32)
    h1 = h1 + jnp.dot(a_ref[...], w1a_ref[...], preferred_element_type=jnp.float32)
    h1 = jnp.maximum(h1 + b1_ref[...], 0.0)

    # Layer 2: (TILE_B, 256) @ (256, 256) + b2, ReLU.
    h2 = jnp.dot(h1.astype(cd), w2_ref[...], preferred_element_type=jnp.float32)
    h2 = jnp.maximum(h2 + b2_ref[...], 0.0)

    # Layer 3 (out_features == 1): VPU/XLU lane reduction instead of an N=1 MXU
    # matmul; result is written lane-dense as a (1, TILE_B) block.
    q = jnp.sum(h2 * w3_ref[...].astype(jnp.float32), axis=-1) + b3_ref[0, 0]
    out_ref[...] = q[None, :].astype(out_ref.dtype)


@functools.partial(jax.jit, static_argnames=("tile_b", "compute_dtype"))
def critic_forward(state, action, params, *, tile_b=256, compute_dtype=jnp.float32):
    """Pallas forward pass. state: (B, state_dim), action: (B, action_dim) -> (B, 1)."""
    w1, b1, w2, b2, w3, b3 = params
    B, state_dim = state.shape
    action_dim = action.shape[1]
    hidden = w2.shape[0]

    # Split w1 so that concat([state, action], 1) @ w1 == state @ w1_s + action @ w1_a.
    w1_s = w1[:state_dim].astype(compute_dtype)
    w1_a = w1[state_dim:].astype(compute_dtype)
    w2_c = w2.astype(compute_dtype)
    w3_row = w3.reshape(1, hidden).astype(compute_dtype)   # lane-major (1, 256)
    b1_f = b1.reshape(1, hidden).astype(jnp.float32)
    b2_f = b2.reshape(1, hidden).astype(jnp.float32)
    b3_s = b3.reshape(1, 1).astype(jnp.float32)             # scalar -> SMEM

    # Pad the batch to a multiple of the batch tile.
    n_tiles = pl.cdiv(B, tile_b)
    b_pad = n_tiles * tile_b
    if b_pad != B:
        pad = b_pad - B
        state = jnp.pad(state, ((0, pad), (0, 0)))
        action = jnp.pad(action, ((0, pad), (0, 0)))
    state = state.astype(compute_dtype)
    action = action.astype(compute_dtype)

    const = lambda i: (0, 0)   # weights/biases stay resident (no re-DMA per tile)

    out = pl.pallas_call(
        critic_kernel,
        out_shape=jax.ShapeDtypeStruct((n_tiles, tile_b), jnp.float32),
        grid=(n_tiles,),
        in_specs=[
            pl.BlockSpec((tile_b, state_dim), lambda i: (i, 0)),
            pl.BlockSpec((tile_b, action_dim), lambda i: (i, 0)),
            pl.BlockSpec((state_dim, hidden), const),
            pl.BlockSpec((action_dim, hidden), const),
            pl.BlockSpec((1, hidden), const),
            pl.BlockSpec((hidden, hidden), const),
            pl.BlockSpec((1, hidden), const),
            pl.BlockSpec((1, hidden), const),
            pl.BlockSpec((1, 1), const, memory_space=pltpu.MemorySpace.SMEM),
        ],
        out_specs=pl.BlockSpec((1, tile_b), lambda i: (i, 0)),
        compiler_params=pltpu.CompilerParams(
            dimension_semantics=("parallel",),
        ),
    )(state, action, w1_s, w1_a, b1_f, w2_c, b2_f, w3_row, b3_s)

    # (n_tiles, tile_b) lane-dense -> (B, 1)
    return out.reshape(-1)[:B].reshape(B, 1)


def init_critic_params(key, state_dim, action_dim, hidden=HIDDEN):
    """Deterministic init mimicking nn.Linear's uniform(-1/sqrt(fan_in), 1/sqrt(fan_in))."""
    dims = [(state_dim + action_dim, hidden), (hidden, hidden), (hidden, 1)]
    params = []
    for (fan_in, fan_out) in dims:
        key, kw, kb = jax.random.split(key, 3)
        bound = 1.0 / jnp.sqrt(fan_in)
        w = jax.random.uniform(kw, (fan_in, fan_out), jnp.float32, -bound, bound)
        b = jax.random.uniform(kb, (1, fan_out), jnp.float32, -bound, bound)
        params += [w, b]
    return tuple(params)


def critic_reference(state, action, params):
    """Pure-JAX reference for correctness checking (matches the PyTorch module)."""
    w1, b1, w2, b2, w3, b3 = params
    sa = jnp.concatenate([state, action], axis=1)
    h1 = jnp.maximum(sa @ w1 + b1, 0.0)
    h2 = jnp.maximum(h1 @ w2 + b2, 0.0)
    return h2 @ w3 + b3


if __name__ == "__main__":
    state_dim = 12
    action_dim = 4

    key = jax.random.PRNGKey(0)
    k_state, k_action, k_params = jax.random.split(key, 3)
    params = init_critic_params(k_params, state_dim, action_dim)

    # Test 1: tiny batch (spec-sized), f32, strict tolerance.
    batch = 2
    state = jax.random.normal(k_state, (batch, state_dim), jnp.float32)
    action = jax.random.normal(k_action, (batch, action_dim), jnp.float32)
    q = jax.block_until_ready(critic_forward(state, action, params))
    q_ref = critic_reference(state, action, params)
    assert q.shape == (batch, 1)
    assert jnp.allclose(q, q_ref, atol=1e-4, rtol=1e-4)

    # Test 2: batch that spans multiple tiles + padding, f32, strict tolerance.
    batch2 = 300
    state2 = jax.random.normal(k_state, (batch2, state_dim), jnp.float32)
    action2 = jax.random.normal(k_action, (batch2, action_dim), jnp.float32)
    q2 = jax.block_until_ready(critic_forward(state2, action2, params))
    q2_ref = critic_reference(state2, action2, params)
    assert q2.shape == (batch2, 1)
    assert jnp.allclose(q2, q2_ref, atol=1e-4, rtol=1e-4)

    # Test 3: bf16 compute path (weights + activation tiles), f32 accumulation.
    q3 = jax.block_until_ready(
        critic_forward(state2, action2, params, compute_dtype=jnp.bfloat16))
    assert q3.shape == (batch2, 1)
    assert jnp.allclose(q3, q2_ref, atol=1e-1, rtol=1e-1)

    print("KERNEL_OK")
</pallas_src>

<mosaic_0001>
module attributes {stable_mosaic.version = 11 : i64} {
  func.func @critic_kernel(%arg0: i32, %arg1: memref<256x12xf32, #tpu.memory_space<vmem>>, %arg2: memref<256x4xf32, #tpu.memory_space<vmem>>, %arg3: memref<12x256xf32, #tpu.memory_space<vmem>>, %arg4: memref<4x256xf32, #tpu.memory_space<vmem>>, %arg5: memref<1x256xf32, #tpu.memory_space<vmem>>, %arg6: memref<256x256xf32, #tpu.memory_space<vmem>>, %arg7: memref<1x256xf32, #tpu.memory_space<vmem>>, %arg8: memref<1x256xf32, #tpu.memory_space<vmem>>, %arg9: memref<1x1xf32, #tpu.memory_space<smem>>, %arg10: memref<1x256xf32, #tpu.memory_space<vmem>>) attributes {dimension_semantics = [#tpu.dimension_semantics<parallel>], iteration_bounds = array<i64: 1>, scalar_prefetch = 0 : i64, scratch_operands = 0 : i64, tpu.core_type = #tpu.core_type<tc>, window_params = [{transform_indices = @transform_0, window_bounds = array<i64: 256, 12>}, {transform_indices = @transform_1, window_bounds = array<i64: 256, 4>}, {pipeline_mode = #tpu.pipeline_mode<synchronous>, transform_indices = @transform_2, window_bounds = array<i64: 12, 256>}, {pipeline_mode = #tpu.pipeline_mode<synchronous>, transform_indices = @transform_3, window_bounds = array<i64: 4, 256>}, {pipeline_mode = #tpu.pipeline_mode<synchronous>, transform_indices = @transform_4, window_bounds = array<i64: 1, 256>}, {pipeline_mode = #tpu.pipeline_mode<synchronous>, transform_indices = @transform_5, window_bounds = array<i64: 256, 256>}, {pipeline_mode = #tpu.pipeline_mode<synchronous>, transform_indices = @transform_6, window_bounds = array<i64: 1, 256>}, {pipeline_mode = #tpu.pipeline_mode<synchronous>, transform_indices = @transform_7, window_bounds = array<i64: 1, 256>}, {transform_indices = @transform_8, window_bounds = array<i64: 1, 1>}, {transform_indices = @transform_9, window_bounds = array<i64: 1, 256>}]} {
    %c0 = arith.constant 0 : index
    %c0_0 = arith.constant 0 : index
    %0 = vector.load %arg1[%c0, %c0_0] : memref<256x12xf32, #tpu.memory_space<vmem>>, vector<256x12xf32>
    %c0_1 = arith.constant 0 : index
    %c0_2 = arith.constant 0 : index
    %1 = vector.load %arg3[%c0_1, %c0_2] : memref<12x256xf32, #tpu.memory_space<vmem>>, vector<12x256xf32>
    %cst = arith.constant dense<0.000000e+00> : vector<256x256xf32>
    %2 = tpu.matmul %0, %1, %cst {dimension_numbers = #tpu.dot_dimension_numbers<[1], [0], [0], [1], [0, 0, 1, 1], [], []>} : vector<256x12xf32>, vector<12x256xf32>, vector<256x256xf32> -> vector<256x256xf32>
    %c0_3 = arith.constant 0 : index
    %c0_4 = arith.constant 0 : index
    %3 = vector.load %arg2[%c0_3, %c0_4] : memref<256x4xf32, #tpu.memory_space<vmem>>, vector<256x4xf32>
    %c0_5 = arith.constant 0 : index
    %c0_6 = arith.constant 0 : index
    %4 = vector.load %arg4[%c0_5, %c0_6] : memref<4x256xf32, #tpu.memory_space<vmem>>, vector<4x256xf32>
    %cst_7 = arith.constant dense<0.000000e+00> : vector<256x256xf32>
    %5 = tpu.matmul %3, %4, %cst_7 {dimension_numbers = #tpu.dot_dimension_numbers<[1], [0], [0], [1], [0, 0, 1, 1], [], []>} : vector<256x4xf32>, vector<4x256xf32>, vector<256x256xf32> -> vector<256x256xf32>
    %6 = arith.addf %2, %5 : vector<256x256xf32>
    %c0_8 = arith.constant 0 : index
    %c0_9 = arith.constant 0 : index
    %7 = vector.load %arg5[%c0_8, %c0_9] : memref<1x256xf32, #tpu.memory_space<vmem>>, vector<1x256xf32>
    %8 = vector.broadcast %7 : vector<1x256xf32> to vector<256x256xf32>
    %9 = arith.addf %6, %8 : vector<256x256xf32>
    %cst_10 = arith.constant 0.000000e+00 : f32
    %10 = vector.broadcast %cst_10 : f32 to vector<256x256xf32>
    %11 = arith.maximumf %9, %10 : vector<256x256xf32>
    %c0_11 = arith.constant 0 : index
    %c0_12 = arith.constant 0 : index
    %12 = vector.load %arg6[%c0_11, %c0_12] : memref<256x256xf32, #tpu.memory_space<vmem>>, vector<256x256xf32>
    %cst_13 = arith.constant dense<0.000000e+00> : vector<256x256xf32>
    %13 = tpu.matmul %11, %12, %cst_13 {dimension_numbers = #tpu.dot_dimension_numbers<[1], [0], [0], [1], [0, 0, 1, 1], [], []>} : vector<256x256xf32>, vector<256x256xf32>, vector<256x256xf32> -> vector<256x256xf32>
    %c0_14 = arith.constant 0 : index
    %c0_15 = arith.constant 0 : index
    %14 = vector.load %arg7[%c0_14, %c0_15] : memref<1x256xf32, #tpu.memory_space<vmem>>, vector<1x256xf32>
    %15 = vector.broadcast %14 : vector<1x256xf32> to vector<256x256xf32>
    %16 = arith.addf %13, %15 : vector<256x256xf32>
    %cst_16 = arith.constant 0.000000e+00 : f32
    %17 = vector.broadcast %cst_16 : f32 to vector<256x256xf32>
    %18 = arith.maximumf %16, %17 : vector<256x256xf32>
    %c0_17 = arith.constant 0 : index
    %c0_18 = arith.constant 0 : index
    %19 = vector.load %arg8[%c0_17, %c0_18] : memref<1x256xf32, #tpu.memory_space<vmem>>, vector<1x256xf32>
    %20 = vector.broadcast %19 : vector<1x256xf32> to vector<256x256xf32>
    %21 = arith.mulf %18, %20 : vector<256x256xf32>
    %cst_19 = arith.constant dense<0.000000e+00> : vector<256xf32>
    %22 = vector.multi_reduction <add>, %21, %cst_19 [1] : vector<256x256xf32> to vector<256xf32>
    %c0_20 = arith.constant 0 : index
    %c0_21 = arith.constant 0 : index
    %23 = memref.load %arg9[%c0_20, %c0_21] : memref<1x1xf32, #tpu.memory_space<smem>>
    %24 = vector.broadcast %23 : f32 to vector<256xf32>
    %25 = arith.addf %22, %24 : vector<256xf32>
    %26 = vector.shape_cast %25 : vector<256xf32> to vector<1x256xf32>
    %c0_22 = arith.constant 0 : index
    %c0_23 = arith.constant 0 : index
    %27 = vector.load %arg10[%c0_22, %c0_23] : memref<1x256xf32, #tpu.memory_space<vmem>>, vector<1x256xf32>
    tpu.vector_store %arg10[%c0_22, %c0_23], %26 {strides = array<i32>} : memref<1x256xf32, #tpu.memory_space<vmem>>, vector<1x256xf32>,
    return
  }
  func.func @transform_0(%arg0: i32) -> (i32, i32) {
    %c0_i32 = arith.constant 0 : i32
    %c0_i32_0 = arith.constant 0 : i32
    return %arg0, %c0_i32 : i32, i32
  }
  func.func @transform_1(%arg0: i32) -> (i32, i32) {
    %c0_i32 = arith.constant 0 : i32
    %c0_i32_0 = arith.constant 0 : i32
    return %arg0, %c0_i32 : i32, i32
  }
  func.func @transform_2(%arg0: i32) -> (i32, i32) {
    %c0_i32 = arith.constant 0 : i32
    %c0_i32_0 = arith.constant 0 : i32
    %c0_i32_1 = arith.constant 0 : i32
    return %c0_i32, %c0_i32_0 : i32, i32
  }
  func.func @transform_3(%arg0: i32) -> (i32, i32) {
    %c0_i32 = arith.constant 0 : i32
    %c0_i32_0 = arith.constant 0 : i32
    %c0_i32_1 = arith.constant 0 : i32
    return %c0_i32, %c0_i32_0 : i32, i32
  }
  func.func @transform_4(%arg0: i32) -> (i32, i32) {
    %c0_i32 = arith.constant 0 : i32
    %c0_i32_0 = arith.constant 0 : i32
    %c0_i32_1 = arith.constant 0 : i32
    return %c0_i32, %c0_i32_0 : i32, i32
  }
  func.func @transform_5(%arg0: i32) -> (i32, i32) {
    %c0_i32 = arith.constant 0 : i32
    %c0_i32_0 = arith.constant 0 : i32
    %c0_i32_1 = arith.constant 0 : i32
    return %c0_i32, %c0_i32_0 : i32, i32
  }
  func.func @transform_6(%arg0: i32) -> (i32, i32) {
    %c0_i32 = arith.constant 0 : i32
    %c0_i32_0 = arith.constant 0 : i32
    %c0_i32_1 = arith.constant 0 : i32
    return %c0_i32, %c0_i32_0 : i32, i32
  }
  func.func @transform_7(%arg0: i32) -> (i32, i32) {
    %c0_i32 = arith.constant 0 : i32
    %c0_i32_0 = arith.constant 0 : i32
    %c0_i32_1 = arith.constant 0 : i32
    return %c0_i32, %c0_i32_0 : i32, i32
  }
  func.func @transform_8(%arg0: i32) -> (i32, i32) {
    %c0_i32 = arith.constant 0 : i32
    %c0_i32_0 = arith.constant 0 : i32
    %c0_i32_1 = arith.constant 0 : i32
    return %c0_i32, %c0_i32_0 : i32, i32
  }
  func.func @transform_9(%arg0: i32) -> (i32, i32) {
    %c0_i32 = arith.constant 0 : i32
    %c0_i32_0 = arith.constant 0 : i32
    return %arg0, %c0_i32 : i32, i32
  }
}

</mosaic_0001>

<bundles_post_ra>
// kernel: critic_forward.1
= control target key start
LH: loop header
LB: loop body
LE: loop exit
PB: predicated region body
PF: predicated region fallthrough
CT: control target
= control target key end

     0   :  { %15 = vsyncpa [#allocation4], 0  ;;  %s6493_s0 = inlined_call_operand.vmem [shape: f32[256,12], index: 0, kind: input, shape index: {}]   ;;  %s6494_s1 = inlined_call_operand.vmem [shape: f32[256,4], index: 1, kind: input, shape index: {}]   ;;  %s6495_s2 = inlined_call_operand.vmem [shape: f32[12,256], index: 2, kind: input, shape index: {}]   ;;  %s6496_s3 = inlined_call_operand.vmem [shape: f32[4,256], index: 3, kind: input, shape index: {}]   ;;  %s6497_s4 = inlined_call_operand.hbm [shape: f32[1,256], index: 4, kind: input, shape index: {}]   ;;  %s6498_s5 = inlined_call_operand.vmem [shape: f32[256,256], index: 5, kind: input, shape index: {}]   ;;  %s6499_s6 = inlined_call_operand.hbm [shape: f32[1,256], index: 6, kind: input, shape index: {}]   ;;  %s6500_s7 = inlined_call_operand.vmem [shape: f32[1,256], index: 7, kind: input, shape index: {}]   ;;  %s6501_s8 = inlined_call_operand.<no memory space> [shape: f32[1,1], index: 8, kind: input, shape index: {}]   ;;  %s6502_s9 = inlined_call_operand.vmem [shape: f32[1,256], index: 9, kind: output, shape index: {}]  }
   0x1   :  { %16 = vsyncpa [#allocation6], 0  ;;  %s4649_s30 = smov [#allocation3]   ;;  %s4650_s11 = smov [#allocation5]  }
   0x2   :  { %s31_s10 = sshll.u32 %s4649_s30, 4  ;;  %s43_s12 = sshll.u32 %s4650_s11, 4  ;;  %s32_s10 = int_to_ptr.vmem [resolvable:$true] %s31_s10  ;;  %s44_s12 = int_to_ptr.vmem [resolvable:$true] %s43_s12 }
   0x3   :  { %s4613_s13 = scalar_lea.vmem %s32_s10, 32  ;;  %p4618_p1 = scmp.lt.s32.totalorder %s32_s10, %s32_s10 }
   0x4   :  { %p4614_p0 = scmp.ne.s32.totalorder %s32_s10, %s4613_s13  ;;  %p4619_p2 = scmp.lt.s32.totalorder %s4613_s13, %s4613_s13 }
   0x6   :  { %p4620_p3 = por %p4619_p2, %p4618_p1 }
   0x8   :  { %p4621_p4 = pnand %p4620_p3, %p4614_p0 }
   0xa   :  { %4624 = shalt.err (!%p4621_p4)
}
   0xb   :  { %34 = dma.hbm_to_vmem [thread:$0]  %s6497_s4, 32, %s32_s10, [#allocation4]  }
   0xc   :  { %s4633_s16 = scalar_lea.vmem %s44_s12, 32  ;;  %p4638_p6 = scmp.lt.s32.totalorder %s44_s12, %s44_s12 }
   0xd   :  { %p4634_p5 = scmp.ne.s32.totalorder %s44_s12, %s4633_s16  ;;  %p4639_p7 = scmp.lt.s32.totalorder %s4633_s16, %s4633_s16 }
   0xf   :  { %p4640_p8 = por %p4639_p7, %p4638_p6 }
  0x11   :  { %p4641_p9 = pnand %p4640_p8, %p4634_p5 }
  0x13   :  { %4644 = shalt.err (!%p4641_p9)
}
  0x14   :  { %46 = dma.hbm_to_vmem [thread:$0]  %s6499_s6, 32, %s44_s12, [#allocation6]  }
  0x15   :  { %4645 = dma.done.wait [#allocation4], 32  }
  0x16   :  { %4646 = vsyncadd [#allocation4], 4294967264 }
  0x17   :  { %4647 = dma.done.wait [#allocation6], 32  }
  0x18   :  { %4648 = vsyncadd [#allocation6], 4294967264  ;;  %v4651_v0 = vmov 0.0   ;;  %v125_v1 = vld [vmem:[%s6496_s3] sm:$0xff]  ;;  %vm225_vm0 = vcmask 1043456   ;;  %vm128_vm1 = vcmask 31744  }
  0x19   :  { %390 = vmatprep.mubr.f32.mxu1 %v4651_v0  ;;  %294 = vmatprep.mubr.f32.mxu0 %v4651_v0  ;;  %v127_v2 = vcombine.high %v125_v1, %v125_v1  ;;  %v109_v3 = vld [vmem:[%s6494_s1 + $0x80] sm:$0xff]  ;;  %v92_v4 = vld [vmem:[%s6495_s2 + $0x18] sm:$0xf]  ;;  %v91_v5 = vld [vmem:[%s6495_s2 + $0x10] sm:$0xf]  ;;  %vm487_vm2 = vcmask 97280  }
  0x1a   :  { %v90_v6 = vld [vmem:[%s6495_s2 + $0x8] sm:$0xff]  ;;  %v89_v7 = vld [vmem:[%s6495_s2] sm:$0xff]  ;;  %v111_v11 = vld [vmem:[%s6494_s1 + $0x90] sm:$0xff]  ;;  %vm4321_vm3 = vcmask 130112   ;;  %vm4328_vm4 = vcmask 195712   ;;  %vm4335_vm5 = vcmask 261312  }
  0x1b   :  { %4595 = vmatprep.subr.msk.mxu1 %vm225_vm0, %v127_v2  ;;  %4527 = vmatprep.subr.msk.mxu0 %vm225_vm0, %v127_v2  ;;  %v110_v8 = vld [vmem:[%s6494_s1 + $0x88] sm:$0xff]  ;;  %v93_v9 = vld [vmem:[%s6494_s1] sm:$0xff]  ;;  %v95_v12 = vld [vmem:[%s6494_s1 + $0x10] sm:$0xff]  ;;  %vm4342_vm6 = vcmask 326912   ;;  %vm4349_vm7 = vcmask 392512   ;;  %vm4356_vm8 = vcmask 458112  }
  0x1c   :  { %4596 = vmatpush1.msk.msra.mxu1 %vm225_vm0, %v125_v1  ;;  %4528 = vmatpush1.msk.msra.mxu0 %vm225_vm0, %v125_v1  ;;  %v94_v10 = vld [vmem:[%s6494_s1 + $0x8] sm:$0xff]  ;;  %v112_v13 = vld [vmem:[%s6494_s1 + $0x98] sm:$0xff]  ;;  %v113_v15 = vld [vmem:[%s6494_s1 + $0xa0] sm:$0xff]  ;;  %vm4363_vm9 = vcmask 523712   ;;  %vm4370_vm10 = vcmask 589312   ;;  %vm4377_vm11 = vcmask 654912  }
  0x1d   :  { %4545 = vmatmul.mubr.msk.f32.vlgmr.msra.gmra.mxu1 %vm128_vm1, %v109_v3  ;;  %4561 = vmatprep.subr.msk.mxu1 %vm225_vm0, %v92_v4  ;;  %v96_v14 = vld [vmem:[%s6494_s1 + $0x18] sm:$0xff]  ;;  %v97_v16 = vld [vmem:[%s6494_s1 + $0x20] sm:$0xff]  ;;  %v114_v17 = vld [vmem:[%s6494_s1 + $0xa8] sm:$0xff]  ;;  %vm4384_vm12 = vcmask 720512   ;;  %vm4391_vm13 = vcmask 786112   ;;  %vm4398_vm14 = vcmask 851712  }
  0x1e   :  { %4562 = vmatpush1.msk.msra.mxu1 %vm225_vm0, %v91_v5  ;;  %396 = vmatprep.mubr.f32.mxu1 %v4651_v0  ;;  %v98_v18 = vld [vmem:[%s6494_s1 + $0x28] sm:$0xff]  ;;  %v115_v19 = vld [vmem:[%s6494_s1 + $0xb0] sm:$0xff]  ;;  %v116_v21 = vld [vmem:[%s6494_s1 + $0xb8] sm:$0xff]  ;;  %vm4405_vm15 = vcmask 917312   ;;  %vm4412_vm0 = vcmask 982912  }
  0x1f   :  { %620 = vmatprep.subr.mxu1 %v90_v6  ;;  %4529 = vmatmul.mubr.msk.f32.vlgmr.msra.gmra.mxu0 %vm128_vm1, %v93_v9  ;;  %v99_v20 = vld [vmem:[%s6494_s1 + $0x30] sm:$0xff]  ;;  %v100_v22 = vld [vmem:[%s6494_s1 + $0x38] sm:$0xff]  ;;  %v117_v23 = vld [vmem:[%s6494_s1 + $0xc0] sm:$0xff] }
  0x20   :  { %621 = vmatpush1.msra.mxu1 %v89_v7  ;;  %300 = vmatprep.mubr.f32.mxu0 %v4651_v0  ;;  %v101_v24 = vld [vmem:[%s6494_s1 + $0x40] sm:$0xff]  ;;  %v118_v25 = vld [vmem:[%s6494_s1 + $0xc8] sm:$0xff]  ;;  %v119_v27 = vld [vmem:[%s6494_s1 + $0xd0] sm:$0xff] }
  0x21   :  { %4546 = vmatmul.mubr.msk.f32.gmra.mxu1 %vm128_vm1, %v110_v8  ;;  %v102_v26 = vld [vmem:[%s6494_s1 + $0x48] sm:$0xff]  ;;  %v103_v28 = vld [vmem:[%s6494_s1 + $0x50] sm:$0xff]  ;;  %v120_v29 = vld [vmem:[%s6494_s1 + $0xd8] sm:$0xff] }
  0x22   :  { %402 = vmatprep.mubr.f32.mxu1 %v4651_v0  ;;  %v104_v30 = vld [vmem:[%s6494_s1 + $0x58] sm:$0xff]  ;;  %v121_v31 = vld [vmem:[%s6494_s1 + $0xe0] sm:$0xff]  ;;  %v122_v33 = vld [vmem:[%s6494_s1 + $0xe8] sm:$0xff] }
  0x23   :  { %4530 = vmatmul.mubr.msk.f32.gmra.mxu0 %vm128_vm1, %v94_v10  ;;  %v105_v32 = vld [vmem:[%s6494_s1 + $0x60] sm:$0xff]  ;;  %v106_v34 = vld [vmem:[%s6494_s1 + $0x68] sm:$0xff]  ;;  %v123_v35 = vld [vmem:[%s6494_s1 + $0xf0] sm:$0xff] }
  0x24   :  { %306 = vmatprep.mubr.f32.mxu0 %v4651_v0  ;;  %v107_v36 = vld [vmem:[%s6494_s1 + $0x70] sm:$0xff]  ;;  %v124_v37 = vld [vmem:[%s6494_s1 + $0xf8] sm:$0xff]  ;;  %v57_v39 = vld [vmem:[%s6493_s0] sm:$0xff] }
  0x25   :  { %4547 = vmatmul.mubr.msk.f32.gmra.mxu1 %vm128_vm1, %v111_v11  ;;  %v108_v38 = vld [vmem:[%s6494_s1 + $0x78] sm:$0xff]  ;;  %v58_v40 = vld [vmem:[%s6493_s0 + $0x8] sm:$0xff]  ;;  %v59_v41 = vld [vmem:[%s6493_s0 + $0x10] sm:$0xff] }
  0x26   :  { %408 = vmatprep.mubr.f32.mxu1 %v4651_v0  ;;  %v60_v42 = vld [vmem:[%s6493_s0 + $0x18] sm:$0xff]  ;;  %v1017_v44 = vld [vmem:[%s6498_s5 + $0xf0] sm:$0xff]  ;;  %v1016_v45 = vld [vmem:[%s6498_s5 + $0xe8] sm:$0xff] }
  0x27   :  { %4531 = vmatmul.mubr.msk.f32.gmra.mxu0 %vm128_vm1, %v95_v12  ;;  %v1018_v43 = vld [vmem:[%s6498_s5 + $0xf8] sm:$0xff]  ;;  %v1015_v46 = vld [vmem:[%s6498_s5 + $0xe0] sm:$0xff]  ;;  %v1013_v49 = vld [vmem:[%s6498_s5 + $0xd0] sm:$0xff] }
  0x28   :  { %312 = vmatprep.mubr.f32.mxu0 %v4651_v0  ;;  %1063 = vmatprep.subr.mxu0 %v1018_v43  ;;  %v61_v47 = vld [vmem:[%s6493_s0 + $0x20] sm:$0xff]  ;;  %v1014_v48 = vld [vmem:[%s6498_s5 + $0xd8] sm:$0xff]  ;;  %v1012_v50 = vld [vmem:[%s6498_s5 + $0xc8] sm:$0xff] }
  0x29   :  { %4548 = vmatmul.mubr.msk.f32.gmra.mxu1 %vm128_vm1, %v112_v13  ;;  %1064 = vmatpush1.msra.mxu0 %v1017_v44  ;;  %v1011_v51 = vld [vmem:[%s6498_s5 + $0xc0] sm:$0xff]  ;;  %v62_v52 = vld [vmem:[%s6493_s0 + $0x28] sm:$0xff]  ;;  %v1010_v53 = vld [vmem:[%s6498_s5 + $0xb8] sm:$0xff] }
  0x2a   :  { %414 = vmatprep.mubr.f32.mxu1 %v4651_v0  ;;  %1065 = vmatprep.subr.mxu0 %v1016_v45  ;;  %v1009_v54 = vld [vmem:[%s6498_s5 + $0xb0] sm:$0xff]  ;;  %v1008_v55 = vld [vmem:[%s6498_s5 + $0xa8] sm:$0xff]  ;;  %v1007_v56 = vld [vmem:[%s6498_s5 + $0xa0] sm:$0xff] }
  0x2b   :  { %4532 = vmatmul.mubr.msk.f32.gmra.mxu0 %vm128_vm1, %v96_v14  ;;  %v63_v57 = vld [vmem:[%s6493_s0 + $0x30] sm:$0xff]  ;;  %v1006_v58 = vld [vmem:[%s6498_s5 + $0x98] sm:$0xff]  ;;  %v1004_v60 = vld [vmem:[%s6498_s5 + $0x88] sm:$0xff] }
  0x2c   :  { %318 = vmatprep.mubr.f32.mxu0 %v4651_v0  ;;  %1066 = vmatpush1.msra.mxu0 %v1015_v46  ;;  %v1005_v59 = vld [vmem:[%s6498_s5 + $0x90] sm:$0xff]  ;;  %v1003_v61 = vld [vmem:[%s6498_s5 + $0x80] sm:$0xff]  ;;  %v64_v62 = vld [vmem:[%s6493_s0 + $0x38] sm:$0xff] }
  0x2d   :  { %4549 = vmatmul.mubr.msk.f32.gmra.mxu1 %vm128_vm1, %v113_v15  ;;  %1067 = vmatprep.subr.mxu0 %v1014_v48  ;;  %v1002_v63 = vld [vmem:[%s6498_s5 + $0x78] sm:$0xff]  ;;  %v1001_v1 = vld [vmem:[%s6498_s5 + $0x70] sm:$0xff]  ;;  %v1000_v2 = vld [vmem:[%s6498_s5 + $0x68] sm:$0xff] }
  0x2e   :  { %420 = vmatprep.mubr.f32.mxu1 %v4651_v0  ;;  %1068 = vmatpush1.msra.mxu0 %v1013_v49  ;;  %v999_v3 = vld [vmem:[%s6498_s5 + $0x60] sm:$0xff]  ;;  %v998_v5 = vld [vmem:[%s6498_s5 + $0x58] sm:$0xff]  ;;  %v997_v6 = vld [vmem:[%s6498_s5 + $0x50] sm:$0xff] }
  0x2f   :  { %4533 = vmatmul.mubr.msk.f32.gmra.mxu0 %vm128_vm1, %v97_v16  ;;  %1069 = vmatprep.subr.mxu0 %v1012_v50  ;;  %v65_v4 = vld [vmem:[%s6493_s0 + $0x40] sm:$0xff]  ;;  %v996_v7 = vld [vmem:[%s6498_s5 + $0x48] sm:$0xff]  ;;  %v994_v10 = vld [vmem:[%s6498_s5 + $0x38] sm:$0xff] }
  0x30   :  { %324 = vmatprep.mubr.f32.mxu0 %v4651_v0  ;;  %1070 = vmatpush1.msra.mxu0 %v1011_v51  ;;  %v995_v8 = vld [vmem:[%s6498_s5 + $0x40] sm:$0xff]  ;;  %v66_v9 = vld [vmem:[%s6493_s0 + $0x48] sm:$0xff]  ;;  %v993_v11 = vld [vmem:[%s6498_s5 + $0x30] sm:$0xff] }
  0x31   :  { %4550 = vmatmul.mubr.msk.f32.gmra.mxu1 %vm128_vm1, %v114_v17  ;;  %1071 = vmatprep.subr.mxu0 %v1010_v53  ;;  %v992_v12 = vld [vmem:[%s6498_s5 + $0x28] sm:$0xff]  ;;  %v991_v13 = vld [vmem:[%s6498_s5 + $0x20] sm:$0xff]  ;;  %v67_v14 = vld [vmem:[%s6493_s0 + $0x50] sm:$0xff] }
  0x32   :  { %426 = vmatprep.mubr.f32.mxu1 %v4651_v0  ;;  %1072 = vmatpush1.msra.mxu0 %v1009_v54  ;;  %v990_v15 = vld [vmem:[%s6498_s5 + $0x18] sm:$0xff]  ;;  %v989_v16 = vld [vmem:[%s6498_s5 + $0x10] sm:$0xff]  ;;  %v988_v17 = vld [vmem:[%s6498_s5 + $0x8] sm:$0xff] }
  0x33   :  { %4534 = vmatmul.mubr.msk.f32.gmra.mxu0 %vm128_vm1, %v98_v18  ;;  %1073 = vmatprep.subr.mxu0 %v1008_v55  ;;  %v987_v18 = vld [vmem:[%s6498_s5] sm:$0xff]  ;;  %v1030_v45 = vld [vmem:[%s6498_s5 + $0x158] sm:$0xff]  ;;  %v1029_v46 = vld [vmem:[%s6498_s5 + $0x150] sm:$0xff] }
  0x34   :  { %330 = vmatprep.mubr.f32.mxu0 %v4651_v0  ;;  %1074 = vmatpush1.msra.mxu0 %v1007_v56  ;;  %v1031_v43 = vld [vmem:[%s6498_s5 + $0x160] sm:$0xff]  ;;  %v74_v49 = vld [vmem:[%s6493_s0 + $0x88] sm:$0xff]  ;;  %v1026_v50 = vld [vmem:[%s6498_s5 + $0x138] sm:$0xff] }
  0x35   :  { %4551 = vmatmul.mubr.msk.f32.gmra.mxu1 %vm128_vm1, %v115_v19  ;;  %1075 = vmatprep.subr.mxu0 %v1006_v58  ;;  %v68_v19 = vld [vmem:[%s6493_s0 + $0x58] sm:$0xff]  ;;  %v73_v44 = vld [vmem:[%s6493_s0 + $0x80] sm:$0xff]  ;;  %v1025_v51 = vld [vmem:[%s6498_s5 + $0x130] sm:$0xff] }
  0x36   :  { %432 = vmatprep.mubr.f32.mxu1 %v4651_v0  ;;  %1076 = vmatpush1.msra.mxu0 %v1005_v59  ;;  %v1027_v48 = vld [vmem:[%s6498_s5 + $0x140] sm:$0xff]  ;;  %v75_v54 = vld [vmem:[%s6493_s0 + $0x90] sm:$0xff]  ;;  %v1022_v55 = vld [vmem:[%s6498_s5 + $0x118] sm:$0xff] }
  0x37   :  { %4535 = vmatmul.mubr.msk.f32.gmra.mxu0 %vm128_vm1, %v99_v20  ;;  %1077 = vmatprep.subr.mxu0 %v1004_v60  ;;  %v1050_v20 = vld [vmem:[%s6498_s5 + $0x1f8] sm:$0xff]  ;;  %v1023_v53 = vld [vmem:[%s6498_s5 + $0x120] sm:$0xff]  ;;  %v1021_v56 = vld [vmem:[%s6498_s5 + $0x110] sm:$0xff] }
  0x38   :  { %336 = vmatprep.mubr.f32.mxu0 %v4651_v0  ;;  %1078 = vmatpush1.msra.mxu0 %v1003_v61  ;;  %v1019_v58 = vld [vmem:[%s6498_s5 + $0x100] sm:$0xff]  ;;  %v76_v59 = vld [vmem:[%s6493_s0 + $0x98] sm:$0xff]  ;;  %v78_v61 = vld [vmem:[%s6493_s0 + $0xa8] sm:$0xff] }
  0x39   :  { %4552 = vmatmul.mubr.msk.f32.gmra.mxu1 %vm128_vm1, %v116_v21  ;;  %1079 = vmatprep.subr.mxu0 %v1002_v63  ;;  %v1049_v21 = vld [vmem:[%s6498_s5 + $0x1f0] sm:$0xff]  ;;  %v77_v60 = vld [vmem:[%s6493_s0 + $0xa0] sm:$0xff]  ;;  %v80_v63 = vld [vmem:[%s6493_s0 + $0xb8] sm:$0xff] }
  0x3a   :  { %438 = vmatprep.mubr.f32.mxu1 %v4651_v0  ;;  %1080 = vmatpush1.msra.mxu0 %v1001_v1  ;;  %v81_v1 = vld [vmem:[%s6493_s0 + $0xc0] sm:$0xff] }
  0x3b   :  { %4536 = vmatmul.mubr.msk.f32.gmra.mxu0 %vm128_vm1, %v100_v22  ;;  %1081 = vmatprep.subr.mxu0 %v1000_v2  ;;  %v1048_v22 = vld [vmem:[%s6498_s5 + $0x1e8] sm:$0xff] }
  0x3c   :  { %342 = vmatprep.mubr.f32.mxu0 %v4651_v0  ;;  %1082 = vmatpush1.msra.mxu0 %v999_v3  ;;  %v82_v2 = vld [vmem:[%s6493_s0 + $0xc8] sm:$0xff]  ;;  %v83_v3 = vld [vmem:[%s6493_s0 + $0xd0] sm:$0xff] }
  0x3d   :  { %4553 = vmatmul.mubr.msk.f32.gmra.mxu1 %vm128_vm1, %v117_v23  ;;  %1083 = vmatprep.subr.mxu0 %v998_v5  ;;  %v1047_v23 = vld [vmem:[%s6498_s5 + $0x1e0] sm:$0xff] }
  0x3e   :  { %444 = vmatprep.mubr.f32.mxu1 %v4651_v0  ;;  %1084 = vmatpush1.msra.mxu0 %v997_v6  ;;  %v85_v5 = vld [vmem:[%s6493_s0 + $0xe0] sm:$0xff]  ;;  %v86_v6 = vld [vmem:[%s6493_s0 + $0xe8] sm:$0xff] }
  0x3f   :  { %4537 = vmatmul.mubr.msk.f32.gmra.mxu0 %vm128_vm1, %v101_v24  ;;  %1085 = vmatprep.subr.mxu0 %v996_v7  ;;  %v69_v24 = vld [vmem:[%s6493_s0 + $0x60] sm:$0xff]  ;;  %v87_v7 = vld [vmem:[%s6493_s0 + $0xf0] sm:$0xff] }
  0x40   :  { %348 = vmatprep.mubr.f32.mxu0 %v4651_v0  ;;  %1086 = vmatpush1.msra.mxu0 %v995_v8  ;;  %v88_v8 = vld [vmem:[%s6493_s0 + $0xf8] sm:$0xff] }
  0x41   :  { %4554 = vmatmul.mubr.msk.f32.gmra.mxu1 %vm128_vm1, %v118_v25  ;;  %1087 = vmatprep.subr.mxu0 %v994_v10  ;;  %v1046_v25 = vld [vmem:[%s6498_s5 + $0x1d8] sm:$0xff] }
  0x42   :  { %450 = vmatprep.mubr.f32.mxu1 %v4651_v0  ;;  %1088 = vmatpush1.msra.mxu0 %v993_v11 }
  0x43   :  { %4538 = vmatmul.mubr.msk.f32.gmra.mxu0 %vm128_vm1, %v102_v26  ;;  %1089 = vmatprep.subr.mxu0 %v992_v12  ;;  %v1045_v26 = vld [vmem:[%s6498_s5 + $0x1d0] sm:$0xff] }
  0x44   :  { %354 = vmatprep.mubr.f32.mxu0 %v4651_v0  ;;  %1090 = vmatpush1.msra.mxu0 %v991_v13 }
  0x45   :  { %4555 = vmatmul.mubr.msk.f32.gmra.mxu1 %vm128_vm1, %v119_v27  ;;  %1091 = vmatprep.subr.mxu0 %v990_v15  ;;  %v1044_v27 = vld [vmem:[%s6498_s5 + $0x1c8] sm:$0xff] }
  0x46   :  { %456 = vmatprep.mubr.f32.mxu1 %v4651_v0  ;;  %1092 = vmatpush1.msra.mxu0 %v989_v16 }
  0x47   :  { %4539 = vmatmul.mubr.msk.f32.gmra.mxu0 %vm128_vm1, %v103_v28  ;;  %1093 = vmatprep.subr.mxu0 %v988_v17  ;;  %v1043_v28 = vld [vmem:[%s6498_s5 + $0x1c0] sm:$0xff] }
  0x48   :  { %360 = vmatprep.mubr.f32.mxu0 %v4651_v0  ;;  %1094 = vmatpush1.msra.mxu0 %v987_v18 }
  0x49   :  { %4556 = vmatmul.mubr.msk.f32.gmra.mxu1 %vm128_vm1, %v120_v29  ;;  %1095 = vmatprep.subr.mxu0 %v1050_v20  ;;  %v70_v29 = vld [vmem:[%s6493_s0 + $0x68] sm:$0xff] }
  0x4a   :  { %462 = vmatprep.mubr.f32.mxu1 %v4651_v0  ;;  %1096 = vmatpush2.msra.mxu0 %v1049_v21 }
  0x4b   :  { %4540 = vmatmul.mubr.msk.f32.gmra.mxu0 %vm128_vm1, %v104_v30  ;;  %1097 = vmatprep.subr.mxu0 %v1048_v22  ;;  %v1042_v30 = vld [vmem:[%s6498_s5 + $0x1b8] sm:$0xff] }
  0x4c   :  { %366 = vmatprep.mubr.f32.mxu0 %v4651_v0  ;;  %1098 = vmatpush2.msra.mxu0 %v1047_v23 }
  0x4d   :  { %4557 = vmatmul.mubr.msk.f32.gmra.mxu1 %vm128_vm1, %v121_v31  ;;  %1099 = vmatprep.subr.mxu0 %v1046_v25  ;;  %v1041_v31 = vld [vmem:[%s6498_s5 + $0x1b0] sm:$0xff] }
  0x4e   :  { %468 = vmatprep.mubr.f32.mxu1 %v4651_v0  ;;  %1100 = vmatpush2.msra.mxu0 %v1045_v26 }
  0x4f   :  { %4541 = vmatmul.mubr.msk.f32.gmra.mxu0 %vm128_vm1, %v105_v32  ;;  %1101 = vmatprep.subr.mxu0 %v1044_v27  ;;  %v1040_v32 = vld [vmem:[%s6498_s5 + $0x1a8] sm:$0xff] }
  0x50   :  { %372 = vmatprep.mubr.f32.mxu0 %v4651_v0  ;;  %1102 = vmatpush2.msra.mxu0 %v1043_v28 }
  0x51   :  { %4558 = vmatmul.mubr.msk.f32.gmra.mxu1 %vm128_vm1, %v122_v33  ;;  %1103 = vmatprep.subr.mxu0 %v1042_v30  ;;  %v1039_v33 = vld [vmem:[%s6498_s5 + $0x1a0] sm:$0xff] }
  0x52   :  { %474 = vmatprep.mubr.f32.mxu1 %v4651_v0  ;;  %1104 = vmatpush2.msra.mxu0 %v1041_v31 }
  0x53   :  { %4542 = vmatmul.mubr.msk.f32.gmra.mxu0 %vm128_vm1, %v106_v34  ;;  %1105 = vmatprep.subr.mxu0 %v1040_v32  ;;  %v71_v34 = vld [vmem:[%s6493_s0 + $0x70] sm:$0xff] }
  0x54   :  { %378 = vmatprep.mubr.f32.mxu0 %v4651_v0  ;;  %1106 = vmatpush2.msra.mxu0 %v1039_v33 }
  0x55   :  { %4559 = vmatmul.mubr.msk.f32.gmra.mxu1 %vm128_vm1, %v123_v35  ;;  %v1038_v35 = vld [vmem:[%s6498_s5 + $0x198] sm:$0xff] }
  0x56   :  { %480 = vmatprep.mubr.f32.mxu1 %v4651_v0  ;;  %1107 = vmatprep.subr.mxu0 %v1038_v35 }
  0x57   :  { %4543 = vmatmul.mubr.msk.f32.gmra.mxu0 %vm128_vm1, %v107_v36  ;;  %v1037_v36 = vld [vmem:[%s6498_s5 + $0x190] sm:$0xff] }
  0x58   :  { %384 = vmatprep.mubr.f32.mxu0 %v4651_v0  ;;  %1108 = vmatpush2.msra.mxu0 %v1037_v36 }
  0x59   :  { %4560 = vmatmul.mubr.msk.f32.gmra.mxu1 %vm128_vm1, %v124_v37  ;;  %v1036_v37 = vld [vmem:[%s6498_s5 + $0x188] sm:$0xff] }
  0x5a   :  { %654 = vmatprep.mubr.f32.mxu1 %v4651_v0  ;;  %1109 = vmatprep.subr.mxu0 %v1036_v37 }
  0x5b   :  { %4544 = vmatmul.mubr.msk.f32.gmra.mxu0 %vm128_vm1, %v108_v38  ;;  %v1035_v38 = vld [vmem:[%s6498_s5 + $0x180] sm:$0xff]  ;;  %vm4419_vm1 = vcmask 1048512  }
  0x5c   :  { %1110 = vmatpush2.msra.mxu0 %v1035_v38 }
  0x5d   :  { %4563 = vmatmul.mubr.msk.f32.vlgmr.msra.gmra.mxu1 %vm487_vm2, %v57_v39  ;;  %v72_v39 = vld [vmem:[%s6493_s0 + $0x78] sm:$0xff] }
  0x5e   :  { %660 = vmatprep.mubr.f32.mxu1 %v4651_v0 }
  0x61   :  { %4564 = vmatmul.mubr.msk.f32.gmra.mxu1 %vm487_vm2, %v58_v40  ;;  %v1034_v40 = vld [vmem:[%s6498_s5 + $0x178] sm:$0xff] }
  0x62   :  { %666 = vmatprep.mubr.f32.mxu1 %v4651_v0  ;;  %1111 = vmatprep.subr.mxu0 %v1034_v40 }
  0x65   :  { %4565 = vmatmul.mubr.msk.f32.gmra.mxu1 %vm487_vm2, %v59_v41  ;;  %v1033_v41 = vld [vmem:[%s6498_s5 + $0x170] sm:$0xff] }
  0x66   :  { %672 = vmatprep.mubr.f32.mxu1 %v4651_v0  ;;  %1112 = vmatpush2.msra.mxu0 %v1033_v41 }
  0x69   :  { %4566 = vmatmul.mubr.msk.f32.gmra.mxu1 %vm487_vm2, %v60_v42  ;;  %v1032_v42 = vld [vmem:[%s6498_s5 + $0x168] sm:$0xff] }
  0x6a   :  { %678 = vmatprep.mubr.f32.mxu1 %v4651_v0  ;;  %1113 = vmatprep.subr.mxu0 %v1032_v42 }
  0x6b   :  { %1114 = vmatpush2.msra.mxu0 %v1031_v43 }
  0x6c   :  { %1115 = vmatprep.subr.mxu0 %v1030_v45 }
  0x6d   :  { %4567 = vmatmul.mubr.msk.f32.gmra.mxu1 %vm487_vm2, %v61_v47  ;;  %1116 = vmatpush2.msra.mxu0 %v1029_v46  ;;  %v1028_v47 = vld [vmem:[%s6498_s5 + $0x148] sm:$0xff] }
  0x6e   :  { %684 = vmatprep.mubr.f32.mxu1 %v4651_v0  ;;  %1117 = vmatprep.subr.mxu0 %v1028_v47 }
  0x6f   :  { %1118 = vmatpush2.msra.mxu0 %v1027_v48  ;;  %v6503_v48 = vlaneseq }
  0x70   :  { %1119 = vmatprep.subr.mxu0 %v1026_v50 }
  0x71   :  { %4568 = vmatmul.mubr.msk.f32.gmra.mxu1 %vm487_vm2, %v62_v52  ;;  %1120 = vmatpush2.msra.mxu0 %v1025_v51  ;;  %v1024_v52 = vld [vmem:[%s6498_s5 + $0x128] sm:$0xff] }
  0x72   :  { %690 = vmatprep.mubr.f32.mxu1 %v4651_v0  ;;  %1121 = vmatprep.subr.mxu0 %v1024_v52  ;;  %v5312_v52 = vshrl.u32 %v6503_v48, 7 }
  0x73   :  { %1122 = vmatpush2.msra.mxu0 %v1023_v53 }
  0x74   :  { %1123 = vmatprep.subr.mxu0 %v1022_v55  ;;  %6511 = vst [vmem:[#allocation9_spill] sm:$0xff] %v5312_v52 }
  0x75   :  { %4569 = vmatmul.mubr.msk.f32.gmra.mxu1 %vm487_vm2, %v63_v57  ;;  %1124 = vmatpush2.msra.mxu0 %v1021_v56  ;;  %v1020_v57 = vld [vmem:[%s6498_s5 + $0x108] sm:$0xff]  ;;  %v5321_v56 = vsub.s32 0, %v5312_v52 }
  0x76   :  { %696 = vmatprep.mubr.f32.mxu1 %v4651_v0  ;;  %1125 = vmatprep.subr.mxu0 %v1020_v57  ;;  %v847_v57 = vld [vmem:[#allocation3] sm:$0x3] }
  0x77   :  { %1126 = vmatpush2.msra.mxu0 %v1019_v58  ;;  %6514 = vst [vmem:[#allocation12_spill] sm:$0xff] %v5321_v56  ;;  %v5324_v58 = vsub.s32 1, %v5312_v52 }
  0x79   :  { %4570 = vmatmul.mubr.msk.f32.gmra.mxu1 %vm487_vm2, %v64_v62  ;;  %v79_v62 = vld [vmem:[%s6493_s0 + $0xb0] sm:$0xff]  ;;  %6515 = vst [vmem:[#allocation13_spill] sm:$0xff] %v5324_v58 }
  0x7a   :  { %702 = vmatprep.mubr.f32.mxu1 %v4651_v0 }
  0x7d   :  { %4571 = vmatmul.mubr.msk.f32.gmra.mxu1 %vm487_vm2, %v65_v4  ;;  %v84_v4 = vld [vmem:[%s6493_s0 + $0xd8] sm:$0xff] }
  0x7e   :  { %708 = vmatprep.mubr.f32.mxu1 %v4651_v0 }
  0x81   :  { %4572 = vmatmul.mubr.msk.f32.gmra.mxu1 %vm487_vm2, %v66_v9 }
  0x82   :  { %714 = vmatprep.mubr.f32.mxu1 %v4651_v0 }
  0x85   :  { %4573 = vmatmul.mubr.msk.f32.gmra.mxu1 %vm487_vm2, %v67_v14 }
  0x86   :  { %720 = vmatprep.mubr.f32.mxu1 %v4651_v0 }
  0x89   :  { %4574 = vmatmul.mubr.msk.f32.gmra.mxu1 %vm487_vm2, %v68_v19 }
  0x8a   :  { %726 = vmatprep.mubr.f32.mxu1 %v4651_v0 }
  0x8d   :  { %4575 = vmatmul.mubr.msk.f32.gmra.mxu1 %vm487_vm2, %v69_v24 }
  0x8e   :  { %732 = vmatprep.mubr.f32.mxu1 %v4651_v0 }
  0x91   :  { %4576 = vmatmul.mubr.msk.f32.gmra.mxu1 %vm487_vm2, %v70_v29 }
  0x92   :  { %738 = vmatprep.mubr.f32.mxu1 %v4651_v0 }
  0x95   :  { %4577 = vmatmul.mubr.msk.f32.gmra.mxu1 %vm487_vm2, %v71_v34 }
  0x96   :  { %744 = vmatprep.mubr.f32.mxu1 %v4651_v0 }
  0x99   :  { %4578 = vmatmul.mubr.msk.f32.gmra.mxu1 %vm487_vm2, %v72_v39 }
  0x9a   :  { %750 = vmatprep.mubr.f32.mxu1 %v4651_v0 }
  0x9d   :  { %4579 = vmatmul.mubr.msk.f32.gmra.mxu1 %vm487_vm2, %v73_v44 }
  0x9e   :  { %756 = vmatprep.mubr.f32.mxu1 %v4651_v0 }
  0xa1   :  { %4580 = vmatmul.mubr.msk.f32.gmra.mxu1 %vm487_vm2, %v74_v49 }
  0xa2   :  { %762 = vmatprep.mubr.f32.mxu1 %v4651_v0 }
  0xa5   :  { %4581 = vmatmul.mubr.msk.f32.gmra.mxu1 %vm487_vm2, %v75_v54 }
  0xa6   :  { %768 = vmatprep.mubr.f32.mxu1 %v4651_v0 }
  0xa9   :  { %4582 = vmatmul.mubr.msk.f32.gmra.mxu1 %vm487_vm2, %v76_v59 }
  0xaa   :  { %774 = vmatprep.mubr.f32.mxu1 %v4651_v0 }
  0xad   :  { %4583 = vmatmul.mubr.msk.f32.gmra.mxu1 %vm487_vm2, %v77_v60 }
  0xae   :  { %780 = vmatprep.mubr.f32.mxu1 %v4651_v0 }
  0xb1   :  { %4584 = vmatmul.mubr.msk.f32.gmra.mxu1 %vm487_vm2, %v78_v61 }
  0xb2   :  { %786 = vmatprep.mubr.f32.mxu1 %v4651_v0 }
  0xb5   :  { %4585 = vmatmul.mubr.msk.f32.gmra.mxu1 %vm487_vm2, %v79_v62  ;;  %v5331_v62 = vrot.slane %v847_v57, %v5321_v56 }
  0xb6   :  { %792 = vmatprep.mubr.f32.mxu1 %v4651_v0 }
  0xb9   :  { %4586 = vmatmul.mubr.msk.f32.gmra.mxu1 %vm487_vm2, %v80_v63 }
  0xba   :  { %798 = vmatprep.mubr.f32.mxu1 %v4651_v0 }
  0xbd   :  { %4587 = vmatmul.mubr.msk.f32.gmra.mxu1 %vm487_vm2, %v81_v1  ;;  %v5334_v1 = vrot.slane %v847_v57, %v5324_v58 }
  0xbe   :  { %804 = vmatprep.mubr.f32.mxu1 %v4651_v0 }
  0xc1   :  { %4588 = vmatmul.mubr.msk.f32.gmra.mxu1 %vm487_vm2, %v82_v2 }
  0xc2   :  { %810 = vmatprep.mubr.f32.mxu1 %v4651_v0 }
  0xc5   :  { %4589 = vmatmul.mubr.msk.f32.gmra.mxu1 %vm487_vm2, %v83_v3 }
  0xc6   :  { %816 = vmatprep.mubr.f32.mxu1 %v4651_v0 }
  0xc9   :  { %4590 = vmatmul.mubr.msk.f32.gmra.mxu1 %vm487_vm2, %v84_v4 }
  0xca   :  { %822 = vmatprep.mubr.f32.mxu1 %v4651_v0 }
  0xcd   :  { %4591 = vmatmul.mubr.msk.f32.gmra.mxu1 %vm487_vm2, %v85_v5 }
  0xce   :  { %828 = vmatprep.mubr.f32.mxu1 %v4651_v0 }
  0xd1   :  { %4592 = vmatmul.mubr.msk.f32.gmra.mxu1 %vm487_vm2, %v86_v6 }
  0xd2   :  { %834 = vmatprep.mubr.f32.mxu1 %v4651_v0 }
  0xd5   :  { %4593 = vmatmul.mubr.msk.f32.gmra.mxu1 %vm487_vm2, %v87_v7 }
  0xd6   :  { %840 = vmatprep.mubr.f32.mxu1 %v4651_v0 }
  0xd9   :  { %4594 = vmatmul.mubr.msk.f32.gmra.mxu1 %vm487_vm2, %v88_v8 }
  0xdd   :  { %v5237_v9 = vpop.f32.mrf.mxu1 }
  0xdf   :  { %v5239_v10 = vpop.f32.mrf.mxu1  ;;  %v296_v11 = vpop.f32.mrf.mxu0 }
  0xe1   :  { %v5241_v12 = vpop.f32.mrf.mxu1  ;;  %v298_v14 = vpop.f32.mrf.mxu0 }
  0xe3   :  { %v5243_v13 = vpop.f32.mrf.mxu1  ;;  %v302_v0 = vpop.f32.mrf.mxu0 }
  0xe5   :  { %v5245_v15 = vpop.f32.mrf.mxu1  ;;  %v304_v19 = vpop.f32.mrf.mxu0 }
  0xe7   :  { %v5247_v16 = vpop.f32.mrf.mxu1  ;;  %v308_v22 = vpop.f32.mrf.mxu0 }
  0xe9   :  { %v5249_v17 = vpop.f32.mrf.mxu1  ;;  %v310_v25 = vpop.f32.mrf.mxu0 }
  0xeb   :  { %v5251_v18 = vpop.f32.mrf.mxu1  ;;  %v5265_v28 = vpop.f32.mrf.mxu0 }
  0xed   :  { %v5253_v20 = vpop.f32.mrf.mxu1  ;;  %v5271_v31 = vpop.f32.mrf.mxu0 }
  0xef   :  { %v5255_v21 = vpop.f32.mrf.mxu1  ;;  %v5277_v34 = vpop.f32.mrf.mxu0 }
  0xf1   :  { %v5257_v23 = vpop.f32.mrf.mxu1  ;;  %v5283_v37 = vpop.f32.mrf.mxu0 }
  0xf3   :  { %v5259_v24 = vpop.f32.mrf.mxu1  ;;  %v5289_v40 = vpop.f32.mrf.mxu0 }
  0xf5   :  { %v5261_v26 = vpop.f32.mrf.mxu1  ;;  %v5295_v43 = vpop.f32.mrf.mxu0 }
  0xf7   :  { %v5263_v27 = vpop.f32.mrf.mxu1  ;;  %v5301_v46 = vpop.f32.mrf.mxu0 }
  0xf9   :  { %v5267_v29 = vpop.f32.mrf.mxu1  ;;  %v5307_v50 = vpop.f32.mrf.mxu0 }
  0xfb   :  { %v5269_v30 = vpop.f32.mrf.mxu1  ;;  %v5316_v54 = vpop.f32.mrf.mxu0 }
  0xfd   :  { %v5273_v32 = vpop.f32.mrf.mxu1  ;;  %v5328_v60 = vpop.f32.mrf.mxu0 }
  0xff   :  { %v5275_v33 = vpop.f32.mrf.mxu1  ;;  %v5336_v3 = vpop.f32.mrf.mxu0 }
 0x101   :  { %v5279_v35 = vpop.f32.mrf.mxu1  ;;  %v5340_v52 = vpop.f32.mrf.mxu0 }
 0x103   :  { %v5281_v36 = vpop.f32.mrf.mxu1 }
 0x105   :  { %v5285_v38 = vpop.f32.mrf.mxu1 }
 0x107   :  { %v5287_v39 = vpop.f32.mrf.mxu1 }
 0x109   :  { %v5291_v41 = vpop.f32.mrf.mxu1 }
 0x10b   :  { %v5293_v42 = vpop.f32.mrf.mxu1 }
 0x10d   :  { %v5297_v44 = vpop.f32.mrf.mxu1 }
 0x10f   :  { %v5299_v45 = vpop.f32.mrf.mxu1 }
 0x111   :  { %v5303_v47 = vpop.f32.mrf.mxu1 }
 0x113   :  { %v5305_v49 = vpop.f32.mrf.mxu1 }
 0x115   :  { %v5309_v51 = vpop.f32.mrf.mxu1 }
 0x117   :  { %v5314_v53 = vpop.f32.mrf.mxu1 }
 0x118   :  { %6512 = vst [vmem:[#allocation10_spill] sm:$0xff] %v5314_v53 }
 0x119   :  { %v5318_v55 = vpop.f32.mrf.mxu1 }
 0x11a   :  { %6513 = vst [vmem:[#allocation11_spill] sm:$0xff] %v5318_v55 }
 0x11b   :  { %v5326_v59 = vpop.f32.mrf.mxu1 }
 0x11c   :  { %6516 = vst [vmem:[#allocation14_spill] sm:$0xff] %v5326_v59 }
 0x11d   :  { %v656_v61 = vpop.f32.mrf.mxu1 }
 0x11e   :  { %v657_v63 = vadd.f32 %v656_v61, %v296_v11 }
 0x11f   :  { %v658_v2 = vpop.f32.mrf.mxu1 }
 0x120   :  { %v659_v4 = vadd.f32 %v658_v2, %v298_v14  ;;  %v859_v5 = vadd.f32 %v5331_v62, %v657_v63  ;;  %v5344_v63 = vpop.f32.mrf.mxu0 }
 0x121   :  { %v662_v6 = vpop.f32.mrf.mxu1 }
 0x122   :  { %v860_v7 = vadd.f32 %v5334_v1, %v659_v4  ;;  %v663_v8 = vadd.f32 %v662_v6, %v302_v0  ;;  %v923_v55 = vmax.f32 %v859_v5, 0.0 }
 0x123   :  { %v664_v48 = vpop.f32.mrf.mxu1 }
 0x124   :  { %v924_v59 = vmax.f32 %v860_v7, 0.0  ;;  %v665_v56 = vadd.f32 %v664_v48, %v304_v19  ;;  %v861_v11 = vadd.f32 %v5331_v62, %v663_v8 }
 0x125   :  { %v668_v57 = vpop.f32.mrf.mxu1 }
 0x126   :  { %v862_v61 = vadd.f32 %v5334_v1, %v665_v56  ;;  %v669_v58 = vadd.f32 %v668_v57, %v308_v22  ;;  %1127 = vmatprep.mubr.f32.mxu0 %v924_v59  ;;  %v925_v0 = vmax.f32 %v861_v11, 0.0  ;;  %v5349_v56 = vpop.f32.mrf.mxu0 }
 0x127   :  { %v670_v14 = vpop.f32.mrf.mxu1  ;;  %1128 = vmatmul.mubr.f32.vlgmr.msra.gmra.mxu0 %v923_v55 }
 0x128   :  { %v926_v2 = vmax.f32 %v862_v61, 0.0  ;;  %v671_v4 = vadd.f32 %v670_v14, %v310_v25  ;;  %v863_v6 = vadd.f32 %v5331_v62, %v669_v58 }
 0x129   :  { %v674_v53 = vpop.f32.mrf.mxu1 }
 0x12a   :  { %v864_v19 = vadd.f32 %v5334_v1, %v671_v4  ;;  %v675_v48 = vadd.f32 %v674_v53, %v5265_v28  ;;  %1133 = vmatprep.mubr.f32.mxu0 %v926_v2  ;;  %v927_v59 = vmax.f32 %v863_v6, 0.0  ;;  %v356_v28 = vpop.f32.mrf.mxu0 }
 0x12b   :  { %v676_v5 = vpop.f32.mrf.mxu1  ;;  %1134 = vmatmul.mubr.f32.gmra.mxu0 %v925_v0 }
 0x12c   :  { %v928_v22 = vmax.f32 %v864_v19, 0.0  ;;  %v677_v55 = vadd.f32 %v676_v5, %v5271_v31  ;;  %v865_v7 = vadd.f32 %v5331_v62, %v675_v48  ;;  %v358_v6 = vpop.f32.mrf.mxu0 }
 0x12d   :  { %v680_v25 = vpop.f32.mrf.mxu1 }
 0x12e   :  { %v866_v8 = vadd.f32 %v5334_v1, %v677_v55  ;;  %v681_v58 = vadd.f32 %v680_v25, %v5277_v34  ;;  %1139 = vmatprep.mubr.f32.mxu0 %v928_v22  ;;  %v929_v61 = vmax.f32 %v865_v7, 0.0  ;;  %v362_v7 = vpop.f32.mrf.mxu0 }
 0x12f   :  { %v682_v11 = vpop.f32.mrf.mxu1  ;;  %1140 = vmatmul.mubr.f32.gmra.mxu0 %v927_v59 }
 0x130   :  { %v930_v53 = vmax.f32 %v866_v8, 0.0  ;;  %v683_v57 = vadd.f32 %v682_v11, %v5283_v37  ;;  %v867_v14 = vadd.f32 %v5331_v62, %v681_v58 }
 0x131   :  { %v686_v2 = vpop.f32.mrf.mxu1 }
 0x132   :  { %v868_v31 = vadd.f32 %v5334_v1, %v683_v57  ;;  %v687_v4 = vadd.f32 %v686_v2, %v5289_v40  ;;  %1145 = vmatprep.mubr.f32.mxu0 %v930_v53  ;;  %v931_v48 = vmax.f32 %v867_v14, 0.0 }
 0x133   :  { %v688_v0 = vpop.f32.mrf.mxu1  ;;  %1146 = vmatmul.mubr.f32.gmra.mxu0 %v929_v61  ;;  %v364_v61 = vpop.f32.mrf.mxu0 }
 0x134   :  { %v932_v34 = vmax.f32 %v868_v31, 0.0  ;;  %v689_v19 = vadd.f32 %v688_v0, %v5295_v43  ;;  %v869_v5 = vadd.f32 %v5331_v62, %v687_v4 }
 0x135   :  { %v692_v22 = vpop.f32.mrf.mxu1 }
 0x136   :  { %v870_v37 = vadd.f32 %v5334_v1, %v689_v19  ;;  %v693_v55 = vadd.f32 %v692_v22, %v5301_v46  ;;  %1151 = vmatprep.mubr.f32.mxu0 %v932_v34  ;;  %v933_v8 = vmax.f32 %v869_v5, 0.0  ;;  %v368_v19 = vpop.f32.mrf.mxu0 }
 0x137   :  { %v694_v59 = vpop.f32.mrf.mxu1  ;;  %1152 = vmatmul.mubr.f32.gmra.mxu0 %v931_v48 }
 0x138   :  { %v934_v40 = vmax.f32 %v870_v37, 0.0  ;;  %v695_v25 = vadd.f32 %v694_v59, %v5307_v50  ;;  %v871_v58 = vadd.f32 %v5331_v62, %v693_v55 }
 0x139   :  { %v698_v11 = vpop.f32.mrf.mxu1 }
 0x13a   :  { %v872_v43 = vadd.f32 %v5334_v1, %v695_v25  ;;  %v699_v53 = vadd.f32 %v698_v11, %v5316_v54  ;;  %1157 = vmatprep.mubr.f32.mxu0 %v934_v40  ;;  %v935_v2 = vmax.f32 %v871_v58, 0.0  ;;  %v370_v40 = vpop.f32.mrf.mxu0 }
 0x13b   :  { %v700_v57 = vpop.f32.mrf.mxu1  ;;  %1158 = vmatmul.mubr.f32.gmra.mxu0 %v933_v8 }
 0x13c   :  { %v936_v46 = vmax.f32 %v872_v43, 0.0  ;;  %v701_v14 = vadd.f32 %v700_v57, %v5328_v60  ;;  %v873_v31 = vadd.f32 %v5331_v62, %v699_v53  ;;  %v374_v57 = vpop.f32.mrf.mxu0 }
 0x13d   :  { %v704_v4 = vpop.f32.mrf.mxu1 }
 0x13e   :  { %v874_v50 = vadd.f32 %v5334_v1, %v701_v14  ;;  %v705_v0 = vadd.f32 %v704_v4, %v5336_v3  ;;  %1163 = vmatprep.mubr.f32.mxu0 %v936_v46  ;;  %v937_v5 = vmax.f32 %v873_v31, 0.0 }
 0x13f   :  { %v706_v34 = vpop.f32.mrf.mxu1  ;;  %1164 = vmatmul.mubr.f32.gmra.mxu0 %v935_v2 }
 0x140   :  { %v938_v54 = vmax.f32 %v874_v50, 0.0  ;;  %v707_v48 = vadd.f32 %v706_v34, %v5340_v52  ;;  %v875_v22 = vadd.f32 %v5331_v62, %v705_v0  ;;  %v376_v0 = vpop.f32.mrf.mxu0 }
 0x141   :  { %v710_v37 = vpop.f32.mrf.mxu1 }
 0x142   :  { %v876_v60 = vadd.f32 %v5334_v1, %v707_v48  ;;  %v711_v55 = vadd.f32 %v710_v37, %v5344_v63  ;;  %1169 = vmatprep.mubr.f32.mxu0 %v938_v54  ;;  %v939_v8 = vmax.f32 %v875_v22, 0.0 }
 0x143   :  { %v712_v59 = vpop.f32.mrf.mxu1  ;;  %1170 = vmatmul.mubr.f32.gmra.mxu0 %v937_v5 }
 0x144   :  { %v940_v3 = vmax.f32 %v876_v60, 0.0  ;;  %v713_v25 = vadd.f32 %v712_v59, %v5349_v56  ;;  %v877_v58 = vadd.f32 %v5331_v62, %v711_v55  ;;  %v380_v60 = vpop.f32.mrf.mxu0 }
 0x145   :  { %v716_v11 = vpop.f32.mrf.mxu1 }
 0x146   :  { %v878_v52 = vadd.f32 %v5334_v1, %v713_v25  ;;  %v717_v43 = vadd.f32 %v716_v11, %v356_v28  ;;  %1175 = vmatprep.mubr.f32.mxu0 %v940_v3  ;;  %v941_v14 = vmax.f32 %v877_v58, 0.0  ;;  %v382_v11 = vpop.f32.mrf.mxu0 }
 0x147   :  { %v718_v53 = vpop.f32.mrf.mxu1  ;;  %1176 = vmatmul.mubr.f32.gmra.mxu0 %v939_v8 }
 0x148   :  { %v942_v46 = vmax.f32 %v878_v52, 0.0  ;;  %v719_v63 = vadd.f32 %v718_v53, %v358_v6  ;;  %v879_v2 = vadd.f32 %v5331_v62, %v717_v43 }
 0x149   :  { %v722_v31 = vpop.f32.mrf.mxu1 }
 0x14a   :  { %v880_v4 = vadd.f32 %v5334_v1, %v719_v63  ;;  %v723_v56 = vadd.f32 %v722_v31, %v362_v7  ;;  %1181 = vmatprep.mubr.f32.mxu0 %v942_v46  ;;  %v943_v28 = vmax.f32 %v879_v2, 0.0  ;;  %v386_v2 = vpop.f32.mrf.mxu0 }
 0x14b   :  { %v724_v50 = vpop.f32.mrf.mxu1  ;;  %1182 = vmatmul.mubr.f32.gmra.mxu0 %v941_v14 }
 0x14c   :  { %v944_v34 = vmax.f32 %v880_v4, 0.0  ;;  %v725_v54 = vadd.f32 %v724_v50, %v364_v61  ;;  %v881_v48 = vadd.f32 %v5331_v62, %v723_v56 }
 0x14d   :  { %v728_v5 = vpop.f32.mrf.mxu1 }
 0x14e   :  { %v882_v22 = vadd.f32 %v5334_v1, %v725_v54  ;;  %v729_v6 = vadd.f32 %v728_v5, %v368_v19  ;;  %1187 = vmatprep.mubr.f32.mxu0 %v944_v34  ;;  %v945_v7 = vmax.f32 %v881_v48, 0.0  ;;  %v388_v54 = vpop.f32.mrf.mxu0 }
 0x14f   :  { %v730_v37 = vpop.f32.mrf.mxu1  ;;  %1188 = vmatmul.mubr.f32.gmra.mxu0 %v943_v28 }
 0x150   :  { %v946_v55 = vmax.f32 %v882_v22, 0.0  ;;  %v731_v59 = vadd.f32 %v730_v37, %v370_v40  ;;  %v883_v3 = vadd.f32 %v5331_v62, %v729_v6 }
 0x151   :  { %v734_v25 = vpop.f32.mrf.mxu1 }
 0x152   :  { %v884_v8 = vadd.f32 %v5334_v1, %v731_v59  ;;  %v735_v61 = vadd.f32 %v734_v25, %v374_v57  ;;  %1193 = vmatprep.mubr.f32.mxu0 %v946_v55  ;;  %v947_v19 = vmax.f32 %v883_v3, 0.0 }
 0x153   :  { %v736_v58 = vpop.f32.mrf.mxu1  ;;  %1194 = vmatmul.mubr.f32.gmra.mxu0 %v945_v7 }
 0x154   :  { %v948_v52 = vmax.f32 %v884_v8, 0.0  ;;  %v737_v43 = vadd.f32 %v736_v58, %v376_v0  ;;  %v885_v53 = vadd.f32 %v5331_v62, %v735_v61 }
 0x155   :  { %v740_v46 = vpop.f32.mrf.mxu1 }
 0x156   :  { %v886_v63 = vadd.f32 %v5334_v1, %v737_v43  ;;  %v741_v40 = vadd.f32 %v740_v46, %v380_v60  ;;  %1199 = vmatprep.mubr.f32.mxu0 %v948_v52  ;;  %v949_v57 = vmax.f32 %v885_v53, 0.0 }
 0x157   :  { %v742_v14 = vpop.f32.mrf.mxu1  ;;  %1200 = vmatmul.mubr.f32.gmra.mxu0 %v947_v19 }
 0x158   :  { %v950_v31 = vmax.f32 %v886_v63, 0.0  ;;  %v743_v4 = vadd.f32 %v742_v14, %v382_v11  ;;  %v887_v56 = vadd.f32 %v5331_v62, %v741_v40 }
 0x159   :  { %v746_v50 = vpop.f32.mrf.mxu1 }
 0x15a   :  { %v888_v34 = vadd.f32 %v5334_v1, %v743_v4  ;;  %v747_v0 = vadd.f32 %v746_v50, %v386_v2  ;;  %1205 = vmatprep.mubr.f32.mxu0 %v950_v31  ;;  %v951_v22 = vmax.f32 %v887_v56, 0.0 }
 0x15b   :  { %v748_v28 = vpop.f32.mrf.mxu1  ;;  %1206 = vmatmul.mubr.f32.gmra.mxu0 %v949_v57 }
 0x15c   :  { %v952_v48 = vmax.f32 %v888_v34, 0.0  ;;  %v749_v5 = vadd.f32 %v748_v28, %v388_v54  ;;  %v889_v6 = vadd.f32 %v5331_v62, %v747_v0 }
 0x15d   :  { %v752_v37 = vpop.f32.mrf.mxu1 }
 0x15e   :  { %v890_v60 = vadd.f32 %v5334_v1, %v749_v5  ;;  %v753_v55 = vadd.f32 %v752_v37, %v5237_v9  ;;  %1211 = vmatprep.mubr.f32.mxu0 %v952_v48  ;;  %v953_v25 = vmax.f32 %v889_v6, 0.0 }
 0x15f   :  { %v754_v59 = vpop.f32.mrf.mxu1  ;;  %1212 = vmatmul.mubr.f32.gmra.mxu0 %v951_v22 }
 0x160   :  { %v954_v7 = vmax.f32 %v890_v60, 0.0  ;;  %v755_v3 = vadd.f32 %v754_v59, %v5239_v10  ;;  %v891_v8 = vadd.f32 %v5331_v62, %v753_v55 }
 0x161   :  { %v758_v61 = vpop.f32.mrf.mxu1 }
 0x162   :  { %v892_v58 = vadd.f32 %v5334_v1, %v755_v3  ;;  %v759_v11 = vadd.f32 %v758_v61, %v5241_v12  ;;  %1217 = vmatprep.mubr.f32.mxu0 %v954_v7  ;;  %v955_v19 = vmax.f32 %v891_v8, 0.0 }
 0x163   :  { %v760_v52 = vpop.f32.mrf.mxu1  ;;  %1218 = vmatmul.mubr.f32.gmra.mxu0 %v953_v25 }
 0x164   :  { %v956_v43 = vmax.f32 %v892_v58, 0.0  ;;  %v761_v9 = vadd.f32 %v760_v52, %v5243_v13  ;;  %v893_v53 = vadd.f32 %v5331_v62, %v759_v11 }
 0x165   :  { %v764_v46 = vpop.f32.mrf.mxu1 }
 0x166   :  { %v894_v10 = vadd.f32 %v5334_v1, %v761_v9  ;;  %v765_v63 = vadd.f32 %v764_v46, %v5245_v15  ;;  %1223 = vmatprep.mubr.f32.mxu0 %v956_v43  ;;  %v957_v2 = vmax.f32 %v893_v53, 0.0 }
 0x167   :  { %v766_v40 = vpop.f32.mrf.mxu1  ;;  %1224 = vmatmul.mubr.f32.gmra.mxu0 %v955_v19 }
 0x168   :  { %v958_v14 = vmax.f32 %v894_v10, 0.0  ;;  %v767_v12 = vadd.f32 %v766_v40, %v5247_v16  ;;  %v895_v31 = vadd.f32 %v5331_v62, %v765_v63 }
 0x169   :  { %v770_v4 = vpop.f32.mrf.mxu1 }
 0x16a   :  { %v896_v13 = vadd.f32 %v5334_v1, %v767_v12  ;;  %v771_v57 = vadd.f32 %v770_v4, %v5249_v17  ;;  %1229 = vmatprep.mubr.f32.mxu0 %v958_v14  ;;  %v959_v34 = vmax.f32 %v895_v31, 0.0 }
 0x16b   :  { %v772_v56 = vpop.f32.mrf.mxu1  ;;  %1230 = vmatmul.mubr.f32.gmra.mxu0 %v957_v2 }
 0x16c   :  { %v960_v50 = vmax.f32 %v896_v13, 0.0  ;;  %v773_v15 = vadd.f32 %v772_v56, %v5251_v18  ;;  %v897_v0 = vadd.f32 %v5331_v62, %v771_v57 }
 0x16d   :  { %v776_v54 = vpop.f32.mrf.mxu1 }
 0x16e   :  { %v898_v16 = vadd.f32 %v5334_v1, %v773_v15  ;;  %v777_v28 = vadd.f32 %v776_v54, %v5253_v20  ;;  %1235 = vmatprep.mubr.f32.mxu0 %v960_v50  ;;  %v961_v22 = vmax.f32 %v897_v0, 0.0 }
 0x16f   :  { %v778_v48 = vpop.f32.mrf.mxu1  ;;  %1236 = vmatmul.mubr.f32.gmra.mxu0 %v959_v34 }
 0x170   :  { %v962_v5 = vmax.f32 %v898_v16, 0.0  ;;  %v779_v17 = vadd.f32 %v778_v48, %v5255_v21  ;;  %v899_v6 = vadd.f32 %v5331_v62, %v777_v28 }
 0x171   :  { %v782_v37 = vpop.f32.mrf.mxu1 }
 0x172   :  { %v900_v18 = vadd.f32 %v5334_v1, %v779_v17  ;;  %v783_v60 = vadd.f32 %v782_v37, %v5257_v23  ;;  %1241 = vmatprep.mubr.f32.mxu0 %v962_v5  ;;  %v963_v7 = vmax.f32 %v899_v6, 0.0 }
 0x173   :  { %v784_v55 = vpop.f32.mrf.mxu1  ;;  %1242 = vmatmul.mubr.f32.gmra.mxu0 %v961_v22 }
 0x174   :  { %v964_v59 = vmax.f32 %v900_v18, 0.0  ;;  %v785_v20 = vadd.f32 %v784_v55, %v5259_v24  ;;  %v901_v3 = vadd.f32 %v5331_v62, %v783_v60 }
 0x175   :  { %v788_v25 = vpop.f32.mrf.mxu1 }
 0x176   :  { %v902_v21 = vadd.f32 %v5334_v1, %v785_v20  ;;  %v789_v8 = vadd.f32 %v788_v25, %v5261_v26  ;;  %1247 = vmatprep.mubr.f32.mxu0 %v964_v59  ;;  %v965_v11 = vmax.f32 %v901_v3, 0.0 }
 0x177   :  { %v790_v61 = vpop.f32.mrf.mxu1  ;;  %1248 = vmatmul.mubr.f32.gmra.mxu0 %v963_v7 }
 0x178   :  { %v966_v58 = vmax.f32 %v902_v21, 0.0  ;;  %v791_v23 = vadd.f32 %v790_v61, %v5263_v27  ;;  %v903_v52 = vadd.f32 %v5331_v62, %v789_v8 }
 0x179   :  { %v794_v43 = vpop.f32.mrf.mxu1 }
 0x17a   :  { %v904_v24 = vadd.f32 %v5334_v1, %v791_v23  ;;  %v795_v9 = vadd.f32 %v794_v43, %v5267_v29  ;;  %1253 = vmatprep.mubr.f32.mxu0 %v966_v58  ;;  %v967_v46 = vmax.f32 %v903_v52, 0.0 }
 0x17b   :  { %v796_v19 = vpop.f32.mrf.mxu1  ;;  %1254 = vmatmul.mubr.f32.gmra.mxu0 %v965_v11 }
 0x17c   :  { %v968_v53 = vmax.f32 %v904_v24, 0.0  ;;  %v797_v26 = vadd.f32 %v796_v19, %v5269_v30  ;;  %v905_v10 = vadd.f32 %v5331_v62, %v795_v9  ;;  %v6517_v9 = vld [vmem:[#allocation10_spill] sm:$0xff] }
 0x17d   :  { %v800_v63 = vpop.f32.mrf.mxu1 }
 0x17e   :  { %v906_v27 = vadd.f32 %v5334_v1, %v797_v26  ;;  %v801_v40 = vadd.f32 %v800_v63, %v5273_v32  ;;  %1259 = vmatprep.mubr.f32.mxu0 %v968_v53  ;;  %v969_v2 = vmax.f32 %v905_v10, 0.0 }
 0x17f   :  { %v802_v14 = vpop.f32.mrf.mxu1  ;;  %1260 = vmatmul.mubr.f32.gmra.mxu0 %v967_v46  ;;  %v6518_v46 = vld [vmem:[#allocation11_spill] sm:$0xff] }
 0x180   :  { %v970_v12 = vmax.f32 %v906_v27, 0.0  ;;  %v803_v29 = vadd.f32 %v802_v14, %v5275_v33  ;;  %v907_v31 = vadd.f32 %v5331_v62, %v801_v40  ;;  %v6519_v40 = vld [vmem:[#allocation14_spill] sm:$0xff] }
 0x181   :  { %v806_v4 = vpop.f32.mrf.mxu1 }
 0x182   :  { %v908_v30 = vadd.f32 %v5334_v1, %v803_v29  ;;  %v807_v13 = vadd.f32 %v806_v4, %v5279_v35  ;;  %1265 = vmatprep.mubr.f32.mxu0 %v970_v12  ;;  %v971_v50 = vmax.f32 %v907_v31, 0.0  ;;  %v1051_v4 = vld [vmem:[#allocation5] sm:$0x3] }
 0x183   :  { %v808_v57 = vpop.f32.mrf.mxu1  ;;  %1266 = vmatmul.mubr.f32.gmra.mxu0 %v969_v2 }
 0x184   :  { %v972_v56 = vmax.f32 %v908_v30, 0.0  ;;  %v809_v32 = vadd.f32 %v808_v57, %v5281_v36  ;;  %v909_v15 = vadd.f32 %v5331_v62, %v807_v13  ;;  %v6520_v30 = vld [vmem:[#allocation12_spill] sm:$0xff]  ;;  %v6521_v57 = vld [vmem:[#allocation13_spill] sm:$0xff] }
 0x185   :  { %v812_v34 = vpop.f32.mrf.mxu1  ;;  %v5455_v13 = vrot.slane %v1051_v4, %v6520_v30 }
 0x186   :  { %v910_v33 = vadd.f32 %v5334_v1, %v809_v32  ;;  %v813_v0 = vadd.f32 %v812_v34, %v5285_v38  ;;  %1271 = vmatprep.mubr.f32.mxu0 %v972_v56  ;;  %v973_v28 = vmax.f32 %v909_v15, 0.0  ;;  %v5458_v56 = vrot.slane %v1051_v4, %v6521_v57 }
 0x187   :  { %v814_v54 = vpop.f32.mrf.mxu1  ;;  %1272 = vmatmul.mubr.f32.gmra.mxu0 %v971_v50 }
 0x188   :  { %v974_v16 = vmax.f32 %v910_v33, 0.0  ;;  %v815_v35 = vadd.f32 %v814_v54, %v5287_v39  ;;  %v911_v48 = vadd.f32 %v5331_v62, %v813_v0 }
 0x189   :  { %v818_v5 = vpop.f32.mrf.mxu1 }
 0x18a   :  { %v912_v36 = vadd.f32 %v5334_v1, %v815_v35  ;;  %v819_v17 = vadd.f32 %v818_v5, %v5291_v41  ;;  %1277 = vmatprep.mubr.f32.mxu0 %v974_v16  ;;  %v975_v37 = vmax.f32 %v911_v48, 0.0 }
 0x18b   :  { %v820_v22 = vpop.f32.mrf.mxu1  ;;  %1278 = vmatmul.mubr.f32.gmra.mxu0 %v973_v28 }
 0x18c   :  { %v976_v6 = vmax.f32 %v912_v36, 0.0  ;;  %v821_v38 = vadd.f32 %v820_v22, %v5293_v42  ;;  %v913_v18 = vadd.f32 %v5331_v62, %v819_v17 }
 0x18d   :  { %v824_v60 = vpop.f32.mrf.mxu1 }
 0x18e   :  { %v914_v39 = vadd.f32 %v5334_v1, %v821_v38  ;;  %v825_v55 = vadd.f32 %v824_v60, %v5297_v44  ;;  %1283 = vmatprep.mubr.f32.mxu0 %v976_v6  ;;  %v977_v7 = vmax.f32 %v913_v18, 0.0 }
 0x18f   :  { %v826_v59 = vpop.f32.mrf.mxu1  ;;  %1284 = vmatmul.mubr.f32.gmra.mxu0 %v975_v37 }
 0x190   :  { %v978_v20 = vmax.f32 %v914_v39, 0.0  ;;  %v827_v41 = vadd.f32 %v826_v59, %v5299_v45  ;;  %v915_v3 = vadd.f32 %v5331_v62, %v825_v55 }
 0x191   :  { %v830_v25 = vpop.f32.mrf.mxu1 }
 0x192   :  { %v916_v42 = vadd.f32 %v5334_v1, %v827_v41  ;;  %v831_v21 = vadd.f32 %v830_v25, %v5303_v47  ;;  %1289 = vmatprep.mubr.f32.mxu0 %v978_v20  ;;  %v979_v58 = vmax.f32 %v915_v3, 0.0 }
 0x193   :  { %v832_v8 = vpop.f32.mrf.mxu1  ;;  %1290 = vmatmul.mubr.f32.gmra.mxu0 %v977_v7 }
 0x194   :  { %v980_v61 = vmax.f32 %v916_v42, 0.0  ;;  %v833_v44 = vadd.f32 %v832_v8, %v5305_v49  ;;  %v917_v23 = vadd.f32 %v5331_v62, %v831_v21 }
 0x195   :  { %v836_v11 = vpop.f32.mrf.mxu1 }
 0x196   :  { %v918_v45 = vadd.f32 %v5334_v1, %v833_v44  ;;  %v837_v52 = vadd.f32 %v836_v11, %v5309_v51  ;;  %1295 = vmatprep.mubr.f32.mxu0 %v980_v61  ;;  %v981_v19 = vmax.f32 %v917_v23, 0.0 }
 0x197   :  { %v838_v43 = vpop.f32.mrf.mxu1  ;;  %1296 = vmatmul.mubr.f32.gmra.mxu0 %v979_v58 }
 0x198   :  { %v982_v24 = vmax.f32 %v918_v45, 0.0  ;;  %v839_v47 = vadd.f32 %v838_v43, %v6517_v9  ;;  %v919_v53 = vadd.f32 %v5331_v62, %v837_v52 }
 0x199   :  { %v842_v26 = vpop.f32.mrf.mxu1 }
 0x19a   :  { %v920_v49 = vadd.f32 %v5334_v1, %v839_v47  ;;  %v843_v10 = vadd.f32 %v842_v26, %v6518_v46  ;;  %1301 = vmatprep.mubr.f32.mxu0 %v982_v24  ;;  %v983_v14 = vmax.f32 %v919_v53, 0.0 }
 0x19b   :  { %v844_v63 = vpop.f32.mrf.mxu1  ;;  %1302 = vmatmul.mubr.f32.gmra.mxu0 %v981_v19 }
 0x19c   :  { %v984_v27 = vmax.f32 %v920_v49, 0.0  ;;  %v845_v51 = vadd.f32 %v844_v63, %v6519_v40  ;;  %v921_v12 = vadd.f32 %v5331_v62, %v843_v10  ;;  %v1384_v62 = vld [vmem:[%s6500_s7] sm:$0x3] }
 0x19d   :  { %v5466_v33 = vrot.slane %v1384_v62, %v6520_v30  ;;  %v5469_v0 = vrot.slane %v1384_v62, %v6521_v57 }
 0x19e   :  { %v922_v29 = vadd.f32 %v5334_v1, %v845_v51  ;;  %1307 = vmatprep.mubr.f32.mxu0 %v984_v27  ;;  %v985_v31 = vmax.f32 %v921_v12, 0.0 }
 0x19f   :  { %1308 = vmatmul.mubr.f32.gmra.mxu0 %v983_v14 }
 0x1a0   :  { %v986_v2 = vmax.f32 %v922_v29, 0.0 }
 0x1a2   :  { %1313 = vmatprep.mubr.f32.mxu0 %v986_v2 }
 0x1a3   :  { %1314 = vmatmul.mubr.f32.gmra.mxu0 %v985_v31 }
 0x1e7   :  { %v1129_v32 = vpop.f32.mrf.mxu0 }
 0x1e8   :  { %v1130_v1 = vadd.f32 %v1129_v32, %v5455_v13 }
 0x1e9   :  { %v1131_v50 = vpop.f32.mrf.mxu0 }
 0x1ea   :  { %v1320_v15 = vmax.f32 %v1130_v1, 0.0  ;;  %v1132_v34 = vadd.f32 %v1131_v50, %v5458_v56 }
 0x1eb   :  { %v1135_v54 = vpop.f32.mrf.mxu0 }
 0x1ec   :  { %v1321_v16 = vmax.f32 %v1132_v34, 0.0  ;;  %v1136_v35 = vadd.f32 %v1135_v54, %v5455_v13  ;;  %v1396_v36 = vmul.f32 %v5466_v33, %v1320_v15 }
 0x1ed   :  { %v1137_v28 = vpop.f32.mrf.mxu0 }
 0x1ee   :  { %v1322_v48 = vmax.f32 %v1136_v35, 0.0  ;;  %v1138_v5 = vadd.f32 %v1137_v28, %v5458_v56  ;;  %v1397_v17 = vmul.f32 %v5469_v0, %v1321_v16 }
 0x1ef   :  { %v1141_v22 = vpop.f32.mrf.mxu0 }
 0x1f0   :  { %v1323_v6 = vmax.f32 %v1138_v5, 0.0  ;;  %v1142_v38 = vadd.f32 %v1141_v22, %v5455_v13  ;;  %v1460_v37 = vadd.f32 %v1397_v17, %v1396_v36  ;;  %v1398_v60 = vmul.f32 %v5466_v33, %v1322_v48 }
 0x1f1   :  { %v1143_v18 = vpop.f32.mrf.mxu0 }
 0x1f2   :  { %v1399_v39 = vmul.f32 %v5469_v0, %v1323_v6  ;;  %v1324_v55 = vmax.f32 %v1142_v38, 0.0  ;;  %v1144_v59 = vadd.f32 %v1143_v18, %v5458_v56  ;;  %1461 = vadd.xlane.f32.xlu0 %v1460_v37 }
 0x1f3   :  { %v1147_v20 = vpop.f32.mrf.mxu0 }
 0x1f4   :  { %v1325_v41 = vmax.f32 %v1144_v59, 0.0  ;;  %v1148_v7 = vadd.f32 %v1147_v20, %v5455_v13  ;;  %v1463_v3 = vadd.f32 %v1399_v39, %v1398_v60  ;;  %v1400_v8 = vmul.f32 %v5466_v33, %v1324_v55 }
 0x1f5   :  { %v1149_v25 = vpop.f32.mrf.mxu0  ;;  %v4652_v60 = vmov 0  }
 0x1f6   :  { %v1326_v42 = vmax.f32 %v1148_v7, 0.0  ;;  %v1150_v21 = vadd.f32 %v1149_v25, %v5458_v56  ;;  %1464 = vadd.xlane.f32.xlu0 %v1463_v3  ;;  %v1401_v61 = vmul.f32 %v5469_v0, %v1325_v41  ;;  %4603 = vset.pattern.permute.xlu1 %v4652_v60 }
 0x1f7   :  { %v1153_v44 = vpop.f32.mrf.mxu0  ;;  %4602 = vset.pattern.permute.xlu0 %v4652_v60 }
 0x1f8   :  { %v1327_v58 = vmax.f32 %v1150_v21, 0.0  ;;  %v1154_v23 = vadd.f32 %v1153_v44, %v5455_v13  ;;  %v1466_v11 = vadd.f32 %v1401_v61, %v1400_v8  ;;  %v1402_v52 = vmul.f32 %v5466_v33, %v1326_v42 }
 0x1f9   :  { %v1155_v45 = vpop.f32.mrf.mxu0 }
 0x1fa   :  { %v1403_v43 = vmul.f32 %v5469_v0, %v1327_v58  ;;  %v1328_v24 = vmax.f32 %v1154_v23, 0.0  ;;  %v1156_v9 = vadd.f32 %v1155_v45, %v5458_v56  ;;  %1467 = vadd.xlane.f32.xlu1 %v1466_v11 }
 0x1fb   :  { %v1159_v47 = vpop.f32.mrf.mxu0 }
 0x1fc   :  { %v1329_v19 = vmax.f32 %v1156_v9, 0.0  ;;  %v1160_v53 = vadd.f32 %v1159_v47, %v5455_v13  ;;  %v1469_v26 = vadd.f32 %v1403_v43, %v1402_v52  ;;  %v1404_v46 = vmul.f32 %v5466_v33, %v1328_v24 }
 0x1fd   :  { %v1161_v49 = vpop.f32.mrf.mxu0 }
 0x1fe   :  { %v1405_v10 = vmul.f32 %v5469_v0, %v1329_v19  ;;  %v1330_v63 = vmax.f32 %v1160_v53, 0.0  ;;  %v1162_v27 = vadd.f32 %v1161_v49, %v5458_v56  ;;  %1470 = vadd.xlane.f32.xlu1 %v1469_v26 }
 0x1ff   :  { %v1165_v40 = vpop.f32.mrf.mxu0 }
 0x200   :  { %v1331_v51 = vmax.f32 %v1162_v27, 0.0  ;;  %v1166_v14 = vadd.f32 %v1165_v40, %v5455_v13  ;;  %v1472_v12 = vadd.f32 %v1405_v10, %v1404_v46  ;;  %v1406_v2 = vmul.f32 %v5466_v33, %v1330_v63 }
 0x201   :  { %v1167_v29 = vpop.f32.mrf.mxu0 }
 0x202   :  { %v1407_v31 = vmul.f32 %v5469_v0, %v1331_v51  ;;  %v1332_v4 = vmax.f32 %v1166_v14, 0.0  ;;  %v1168_v32 = vadd.f32 %v1167_v29, %v5458_v56  ;;  %1473 = vadd.xlane.f32.xlu0 %v1472_v12 }
 0x203   :  { %v1171_v62 = vpop.f32.mrf.mxu0 }
 0x204   :  { %v1333_v1 = vmax.f32 %v1168_v32, 0.0  ;;  %v1172_v50 = vadd.f32 %v1171_v62, %v5455_v13  ;;  %v1475_v15 = vadd.f32 %v1407_v31, %v1406_v2  ;;  %v1408_v54 = vmul.f32 %v5466_v33, %v1332_v4 }
 0x205   :  { %v1173_v34 = vpop.f32.mrf.mxu0 }
 0x206   :  { %v1409_v16 = vmul.f32 %v5469_v0, %v1333_v1  ;;  %v1334_v35 = vmax.f32 %v1172_v50, 0.0  ;;  %v1174_v28 = vadd.f32 %v1173_v34, %v5458_v56  ;;  %1476 = vadd.xlane.f32.xlu1 %v1475_v15 }
 0x207   :  { %v1177_v48 = vpop.f32.mrf.mxu0 }
 0x208   :  { %v1335_v5 = vmax.f32 %v1174_v28, 0.0  ;;  %v1178_v36 = vadd.f32 %v1177_v48, %v5455_v13  ;;  %v1478_v17 = vadd.f32 %v1409_v16, %v1408_v54  ;;  %v1410_v6 = vmul.f32 %v5466_v33, %v1334_v35 }
 0x209   :  { %v1179_v22 = vpop.f32.mrf.mxu0 }
 0x20a   :  { %v1411_v38 = vmul.f32 %v5469_v0, %v1335_v5  ;;  %v1336_v37 = vmax.f32 %v1178_v36, 0.0  ;;  %v1180_v18 = vadd.f32 %v1179_v22, %v5458_v56  ;;  %1479 = vadd.xlane.f32.xlu0 %v1478_v17 }
 0x20b   :  { %v1183_v39 = vpop.f32.mrf.mxu0 }
 0x20c   :  { %v1337_v55 = vmax.f32 %v1180_v18, 0.0  ;;  %v1184_v59 = vadd.f32 %v1183_v39, %v5455_v13  ;;  %v1481_v20 = vadd.f32 %v1411_v38, %v1410_v6  ;;  %v1412_v7 = vmul.f32 %v5466_v33, %v1336_v37 }
 0x20d   :  { %v1185_v41 = vpop.f32.mrf.mxu0 }
 0x20e   :  { %v1413_v3 = vmul.f32 %v5469_v0, %v1337_v55  ;;  %v1338_v25 = vmax.f32 %v1184_v59, 0.0  ;;  %v1186_v42 = vadd.f32 %v1185_v41, %v5458_v56  ;;  %1482 = vadd.xlane.f32.xlu1 %v1481_v20 }
 0x20f   :  { %v1189_v21 = vpop.f32.mrf.mxu0 }
 0x210   :  { %v1339_v8 = vmax.f32 %v1186_v42, 0.0  ;;  %v1190_v61 = vadd.f32 %v1189_v21, %v5455_v13  ;;  %v1484_v44 = vadd.f32 %v1413_v3, %v1412_v7  ;;  %v1414_v23 = vmul.f32 %v5466_v33, %v1338_v25 }
 0x211   :  { %v1191_v58 = vpop.f32.mrf.mxu0 }
 0x212   :  { %v1415_v11 = vmul.f32 %v5469_v0, %v1339_v8  ;;  %v1340_v45 = vmax.f32 %v1190_v61, 0.0  ;;  %v1192_v52 = vadd.f32 %v1191_v58, %v5458_v56  ;;  %1485 = vadd.xlane.f32.xlu0 %v1484_v44 }
 0x213   :  { %v1195_v43 = vpop.f32.mrf.mxu0 }
 0x214   :  { %v1341_v24 = vmax.f32 %v1192_v52, 0.0  ;;  %v1196_v9 = vadd.f32 %v1195_v43, %v5455_v13  ;;  %v1487_v47 = vadd.f32 %v1415_v11, %v1414_v23  ;;  %v1416_v53 = vmul.f32 %v5466_v33, %v1340_v45 }
 0x215   :  { %v1197_v19 = vpop.f32.mrf.mxu0 }
 0x216   :  { %v1417_v26 = vmul.f32 %v5469_v0, %v1341_v24  ;;  %v1342_v49 = vmax.f32 %v1196_v9, 0.0  ;;  %v1198_v46 = vadd.f32 %v1197_v19, %v5458_v56  ;;  %1488 = vadd.xlane.f32.xlu1 %v1487_v47 }
 0x217   :  { %v1201_v10 = vpop.f32.mrf.mxu0 }
 0x218   :  { %v1343_v63 = vmax.f32 %v1198_v46, 0.0  ;;  %v1202_v27 = vadd.f32 %v1201_v10, %v5455_v13  ;;  %v1490_v40 = vadd.f32 %v1417_v26, %v1416_v53  ;;  %v1418_v14 = vmul.f32 %v5466_v33, %v1342_v49 }
 0x219   :  { %v1203_v51 = vpop.f32.mrf.mxu0 }
 0x21a   :  { %v1419_v12 = vmul.f32 %v5469_v0, %v1343_v63  ;;  %v1344_v29 = vmax.f32 %v1202_v27, 0.0  ;;  %v1204_v2 = vadd.f32 %v1203_v51, %v5458_v56  ;;  %1491 = vadd.xlane.f32.xlu0 %v1490_v40 }
 0x21b   :  { %v1207_v31 = vpop.f32.mrf.mxu0 }
 0x21c   :  { %v1345_v4 = vmax.f32 %v1204_v2, 0.0  ;;  %v1208_v32 = vadd.f32 %v1207_v31, %v5455_v13  ;;  %v1493_v62 = vadd.f32 %v1419_v12, %v1418_v14  ;;  %v1420_v50 = vmul.f32 %v5466_v33, %v1344_v29 }
 0x21d   :  { %v1209_v1 = vpop.f32.mrf.mxu0 }
 0x21e   :  { %v1421_v15 = vmul.f32 %v5469_v0, %v1345_v4  ;;  %v1346_v34 = vmax.f32 %v1208_v32, 0.0  ;;  %v1210_v54 = vadd.f32 %v1209_v1, %v5458_v56  ;;  %1494 = vadd.xlane.f32.xlu1 %v1493_v62 }
 0x21f   :  { %v1213_v16 = vpop.f32.mrf.mxu0 }
 0x220   :  { %v1347_v35 = vmax.f32 %v1210_v54, 0.0  ;;  %v1214_v28 = vadd.f32 %v1213_v16, %v5455_v13  ;;  %v1496_v48 = vadd.f32 %v1421_v15, %v1420_v50  ;;  %v1422_v36 = vmul.f32 %v5466_v33, %v1346_v34 }
 0x221   :  { %v1215_v5 = vpop.f32.mrf.mxu0 }
 0x222   :  { %v1423_v17 = vmul.f32 %v5469_v0, %v1347_v35  ;;  %v1348_v22 = vmax.f32 %v1214_v28, 0.0  ;;  %v1216_v6 = vadd.f32 %v1215_v5, %v5458_v56  ;;  %1497 = vadd.xlane.f32.xlu0 %v1496_v48 }
 0x223   :  { %v1219_v38 = vpop.f32.mrf.mxu0 }
 0x224   :  { %v1349_v37 = vmax.f32 %v1216_v6, 0.0  ;;  %v1220_v18 = vadd.f32 %v1219_v38, %v5455_v13  ;;  %v1499_v60 = vadd.f32 %v1423_v17, %v1422_v36  ;;  %v1424_v55 = vmul.f32 %v5466_v33, %v1348_v22 }
 0x225   :  { %v1221_v39 = vpop.f32.mrf.mxu0 }
 0x226   :  { %v1425_v59 = vmul.f32 %v5469_v0, %v1349_v37  ;;  %v1350_v20 = vmax.f32 %v1220_v18, 0.0  ;;  %v1222_v41 = vadd.f32 %v1221_v39, %v5458_v56  ;;  %1500 = vadd.xlane.f32.xlu1 %v1499_v60 }
 0x227   :  { %v1225_v7 = vpop.f32.mrf.mxu0 }
 0x228   :  { %v1351_v3 = vmax.f32 %v1222_v41, 0.0  ;;  %v1226_v25 = vadd.f32 %v1225_v7, %v5455_v13  ;;  %v1502_v42 = vadd.f32 %v1425_v59, %v1424_v55  ;;  %v1426_v8 = vmul.f32 %v5466_v33, %v1350_v20 }
 0x229   :  { %v1227_v21 = vpop.f32.mrf.mxu0 }
 0x22a   :  { %v1427_v61 = vmul.f32 %v5469_v0, %v1351_v3  ;;  %v1352_v44 = vmax.f32 %v1226_v25, 0.0  ;;  %v1228_v58 = vadd.f32 %v1227_v21, %v5458_v56  ;;  %1503 = vadd.xlane.f32.xlu0 %v1502_v42 }
 0x22b   :  { %v1231_v23 = vpop.f32.mrf.mxu0 }
 0x22c   :  { %v1353_v11 = vmax.f32 %v1228_v58, 0.0  ;;  %v1232_v45 = vadd.f32 %v1231_v23, %v5455_v13  ;;  %v1505_v52 = vadd.f32 %v1427_v61, %v1426_v8  ;;  %v1428_v24 = vmul.f32 %v5466_v33, %v1352_v44 }
 0x22d   :  { %v1233_v43 = vpop.f32.mrf.mxu0 }
 0x22e   :  { %v1429_v9 = vmul.f32 %v5469_v0, %v1353_v11  ;;  %v1354_v47 = vmax.f32 %v1232_v45, 0.0  ;;  %v1234_v19 = vadd.f32 %v1233_v43, %v5458_v56  ;;  %1506 = vadd.xlane.f32.xlu1 %v1505_v52 }
 0x22f   :  { %v1237_v53 = vpop.f32.mrf.mxu0 }
 0x230   :  { %v1355_v26 = vmax.f32 %v1234_v19, 0.0  ;;  %v1238_v49 = vadd.f32 %v1237_v53, %v5455_v13  ;;  %v1508_v46 = vadd.f32 %v1429_v9, %v1428_v24  ;;  %v1430_v63 = vmul.f32 %v5466_v33, %v1354_v47 }
 0x231   :  { %v1239_v10 = vpop.f32.mrf.mxu0 }
 0x232   :  { %v1431_v27 = vmul.f32 %v5469_v0, %v1355_v26  ;;  %v1356_v40 = vmax.f32 %v1238_v49, 0.0  ;;  %v1240_v51 = vadd.f32 %v1239_v10, %v5458_v56  ;;  %1509 = vadd.xlane.f32.xlu0 %v1508_v46 }
 0x233   :  { %v1243_v14 = vpop.f32.mrf.mxu0 }
 0x234   :  { %v1357_v12 = vmax.f32 %v1240_v51, 0.0  ;;  %v1244_v29 = vadd.f32 %v1243_v14, %v5455_v13  ;;  %v1511_v2 = vadd.f32 %v1431_v27, %v1430_v63  ;;  %v1432_v4 = vmul.f32 %v5466_v33, %v1356_v40 }
 0x235   :  { %v1245_v31 = vpop.f32.mrf.mxu0 }
 0x236   :  { %v1433_v32 = vmul.f32 %v5469_v0, %v1357_v12  ;;  %v1358_v62 = vmax.f32 %v1244_v29, 0.0  ;;  %v1246_v1 = vadd.f32 %v1245_v31, %v5458_v56  ;;  %1512 = vadd.xlane.f32.xlu1 %v1511_v2 }
 0x237   :  { %v1249_v50 = vpop.f32.mrf.mxu0 }
 0x238   :  { %v1359_v15 = vmax.f32 %v1246_v1, 0.0  ;;  %v1250_v34 = vadd.f32 %v1249_v50, %v5455_v13  ;;  %v1514_v54 = vadd.f32 %v1433_v32, %v1432_v4  ;;  %v1434_v35 = vmul.f32 %v5466_v33, %v1358_v62 }
 0x239   :  { %v1251_v16 = vpop.f32.mrf.mxu0 }
 0x23a   :  { %v1435_v28 = vmul.f32 %v5469_v0, %v1359_v15  ;;  %v1360_v48 = vmax.f32 %v1250_v34, 0.0  ;;  %v1252_v5 = vadd.f32 %v1251_v16, %v5458_v56  ;;  %1515 = vadd.xlane.f32.xlu0 %v1514_v54 }
 0x23b   :  { %v1255_v36 = vpop.f32.mrf.mxu0 }
 0x23c   :  { %v1361_v17 = vmax.f32 %v1252_v5, 0.0  ;;  %v1256_v22 = vadd.f32 %v1255_v36, %v5455_v13  ;;  %v1517_v6 = vadd.f32 %v1435_v28, %v1434_v35  ;;  %v1436_v37 = vmul.f32 %v5466_v33, %v1360_v48 }
 0x23d   :  { %v1257_v38 = vpop.f32.mrf.mxu0 }
 0x23e   :  { %v1437_v18 = vmul.f32 %v5469_v0, %v1361_v17  ;;  %v1362_v60 = vmax.f32 %v1256_v22, 0.0  ;;  %v1258_v39 = vadd.f32 %v1257_v38, %v5458_v56  ;;  %1518 = vadd.xlane.f32.xlu1 %v1517_v6 }
 0x23f   :  { %v1261_v55 = vpop.f32.mrf.mxu0 }
 0x240   :  { %v1363_v59 = vmax.f32 %v1258_v39, 0.0  ;;  %v1262_v20 = vadd.f32 %v1261_v55, %v5455_v13  ;;  %v1520_v41 = vadd.f32 %v1437_v18, %v1436_v37  ;;  %v1438_v3 = vmul.f32 %v5466_v33, %v1362_v60 }
 0x241   :  { %v1263_v7 = vpop.f32.mrf.mxu0 }
 0x242   :  { %v1439_v25 = vmul.f32 %v5469_v0, %v1363_v59  ;;  %v1364_v42 = vmax.f32 %v1262_v20, 0.0  ;;  %v1264_v21 = vadd.f32 %v1263_v7, %v5458_v56  ;;  %1521 = vadd.xlane.f32.xlu0 %v1520_v41 }
 0x243   :  { %v1267_v8 = vpop.f32.mrf.mxu0 }
 0x244   :  { %v1365_v61 = vmax.f32 %v1264_v21, 0.0  ;;  %v1268_v44 = vadd.f32 %v1267_v8, %v5455_v13  ;;  %v1523_v58 = vadd.f32 %v1439_v25, %v1438_v3  ;;  %v1440_v11 = vmul.f32 %v5466_v33, %v1364_v42 }
 0x245   :  { %v1269_v23 = vpop.f32.mrf.mxu0 }
 0x246   :  { %v1441_v45 = vmul.f32 %v5469_v0, %v1365_v61  ;;  %v1366_v52 = vmax.f32 %v1268_v44, 0.0  ;;  %v1270_v43 = vadd.f32 %v1269_v23, %v5458_v56  ;;  %1524 = vadd.xlane.f32.xlu1 %v1523_v58 }
 0x247   :  { %v1273_v24 = vpop.f32.mrf.mxu0 }
 0x248   :  { %v1367_v9 = vmax.f32 %v1270_v43, 0.0  ;;  %v1274_v47 = vadd.f32 %v1273_v24, %v5455_v13  ;;  %v1526_v19 = vadd.f32 %v1441_v45, %v1440_v11  ;;  %v1442_v26 = vmul.f32 %v5466_v33, %v1366_v52 }
 0x249   :  { %v1275_v53 = vpop.f32.mrf.mxu0 }
 0x24a   :  { %v1443_v49 = vmul.f32 %v5469_v0, %v1367_v9  ;;  %v1368_v46 = vmax.f32 %v1274_v47, 0.0  ;;  %v1276_v10 = vadd.f32 %v1275_v53, %v5458_v56  ;;  %1527 = vadd.xlane.f32.xlu0 %v1526_v19 }
 0x24b   :  { %v1279_v63 = vpop.f32.mrf.mxu0 }
 0x24c   :  { %v1369_v27 = vmax.f32 %v1276_v10, 0.0  ;;  %v1280_v40 = vadd.f32 %v1279_v63, %v5455_v13  ;;  %v1529_v51 = vadd.f32 %v1443_v49, %v1442_v26  ;;  %v1444_v12 = vmul.f32 %v5466_v33, %v1368_v46 }
 0x24d   :  { %v1281_v14 = vpop.f32.mrf.mxu0 }
 0x24e   :  { %v1445_v29 = vmul.f32 %v5469_v0, %v1369_v27  ;;  %v1370_v2 = vmax.f32 %v1280_v40, 0.0  ;;  %v1282_v31 = vadd.f32 %v1281_v14, %v5458_v56  ;;  %1530 = vadd.xlane.f32.xlu1 %v1529_v51 }
 0x24f   :  { %v1285_v4 = vpop.f32.mrf.mxu0 }
 0x250   :  { %v1371_v32 = vmax.f32 %v1282_v31, 0.0  ;;  %v1286_v62 = vadd.f32 %v1285_v4, %v5455_v13  ;;  %v1532_v1 = vadd.f32 %v1445_v29, %v1444_v12  ;;  %v1446_v15 = vmul.f32 %v5466_v33, %v1370_v2 }
 0x251   :  { %v1287_v50 = vpop.f32.mrf.mxu0 }
 0x252   :  { %v1447_v34 = vmul.f32 %v5469_v0, %v1371_v32  ;;  %v1372_v54 = vmax.f32 %v1286_v62, 0.0  ;;  %v1288_v16 = vadd.f32 %v1287_v50, %v5458_v56  ;;  %1533 = vadd.xlane.f32.xlu0 %v1532_v1  ;;  %v5600_v62 = vstv %s6501_s8  ;;  %v6522_v50 = vld [vmem:[#allocation9_spill] sm:$0xff] }
 0x253   :  { %v1291_v35 = vpop.f32.mrf.mxu0 }
 0x254   :  { %v1373_v28 = vmax.f32 %v1288_v16, 0.0  ;;  %v1292_v48 = vadd.f32 %v1291_v35, %v5455_v13  ;;  %v1535_v5 = vadd.f32 %v1447_v34, %v1446_v15  ;;  %v1448_v17 = vmul.f32 %v5466_v33, %v1372_v54 }
 0x255   :  { %v1293_v36 = vpop.f32.mrf.mxu0  ;;  %v5606_v15 = vsub.s32 3, %v6522_v50  ;;  %v5612_v34 = vsub.s32 5, %v6522_v50  ;;  %v5615_v54 = vsub.s32 6, %v6522_v50  ;;  %v5618_v16 = vsub.s32 7, %v6522_v50 }
 0x256   :  { %v1449_v22 = vmul.f32 %v5469_v0, %v1373_v28  ;;  %v1374_v6 = vmax.f32 %v1292_v48, 0.0  ;;  %v1294_v38 = vadd.f32 %v1293_v36, %v5458_v56  ;;  %1536 = vadd.xlane.f32.xlu1 %v1535_v5 }
 0x257   :  { %v1297_v37 = vpop.f32.mrf.mxu0 }
 0x258   :  { %v1375_v18 = vmax.f32 %v1294_v38, 0.0  ;;  %v1298_v60 = vadd.f32 %v1297_v37, %v5455_v13  ;;  %v1538_v39 = vadd.f32 %v1449_v22, %v1448_v17  ;;  %v1450_v59 = vmul.f32 %v5466_v33, %v1374_v6 }
 0x259   :  { %v1299_v55 = vpop.f32.mrf.mxu0 }
 0x25a   :  { %v1451_v20 = vmul.f32 %v5469_v0, %v1375_v18  ;;  %v1376_v41 = vmax.f32 %v1298_v60, 0.0  ;;  %v1300_v7 = vadd.f32 %v1299_v55, %v5458_v56  ;;  %1539 = vadd.xlane.f32.xlu0 %v1538_v39 }
 0x25b   :  { %v1303_v3 = vpop.f32.mrf.mxu0 }
 0x25c   :  { %v1377_v25 = vmax.f32 %v1300_v7, 0.0  ;;  %v1304_v42 = vadd.f32 %v1303_v3, %v5455_v13  ;;  %v1541_v21 = vadd.f32 %v1451_v20, %v1450_v59  ;;  %v1452_v61 = vmul.f32 %v5466_v33, %v1376_v41 }
 0x25d   :  { %v1305_v8 = vpop.f32.mrf.mxu0 }
 0x25e   :  { %v1453_v44 = vmul.f32 %v5469_v0, %v1377_v25  ;;  %v1378_v58 = vmax.f32 %v1304_v42, 0.0  ;;  %v1306_v23 = vadd.f32 %v1305_v8, %v5458_v56  ;;  %1542 = vadd.xlane.f32.xlu1 %v1541_v21 }
 0x25f   :  { %v1309_v11 = vpop.f32.mrf.mxu0 }
 0x260   :  { %v1379_v45 = vmax.f32 %v1306_v23, 0.0  ;;  %v1310_v52 = vadd.f32 %v1309_v11, %v5455_v13  ;;  %v1544_v43 = vadd.f32 %v1453_v44, %v1452_v61  ;;  %v1454_v9 = vmul.f32 %v5466_v33, %v1378_v58 }
 0x261   :  { %v1311_v24 = vpop.f32.mrf.mxu0 }
 0x262   :  { %v1455_v47 = vmul.f32 %v5469_v0, %v1379_v45  ;;  %v1380_v19 = vmax.f32 %v1310_v52, 0.0  ;;  %v1312_v53 = vadd.f32 %v1311_v24, %v5458_v56  ;;  %1545 = vadd.xlane.f32.xlu0 %v1544_v43 }
 0x263   :  { %v1315_v26 = vpop.f32.mrf.mxu0 }
 0x264   :  { %v1381_v49 = vmax.f32 %v1312_v53, 0.0  ;;  %v1316_v46 = vadd.f32 %v1315_v26, %v5455_v13  ;;  %v1547_v10 = vadd.f32 %v1455_v47, %v1454_v9  ;;  %v1456_v27 = vmul.f32 %v5466_v33, %v1380_v19 }
 0x265   :  { %v1317_v63 = vpop.f32.mrf.mxu0  ;;  %v4653_v13 = vmov 1966171168  }
 0x266   :  { %v1457_v40 = vmul.f32 %v5469_v0, %v1381_v49  ;;  %v1382_v51 = vmax.f32 %v1316_v46, 0.0  ;;  %v1318_v14 = vadd.f32 %v1317_v63, %v5458_v56  ;;  %1548 = vadd.xlane.f32.xlu1 %v1547_v10  ;;  %v2651_v32 = vunpack.c.l.s4 %v4653_v13 }
 0x267   :  { %v5603_v56 = vsub.s32 2, %v6522_v50 }
 0x268   :  { %v1383_v12 = vmax.f32 %v1318_v14, 0.0  ;;  %v1550_v29 = vadd.f32 %v1457_v40, %v1456_v27  ;;  %v1458_v2 = vmul.f32 %v5466_v33, %v1382_v51  ;;  %v2652_v1 = vunpack.c.0.s8 %v2651_v32 }
 0x26a   :  { %v1459_v31 = vmul.f32 %v5469_v0, %v1383_v12  ;;  %1551 = vadd.xlane.f32.xlu0 %v1550_v29  ;;  %v5609_v0 = vsub.s32 4, %v6522_v50  ;;  %v5622_v28 = vsub.s32 %v2652_v1, %v6522_v50 }
 0x26c   :  { %v1553_v4 = vadd.f32 %v1459_v31, %v1458_v2 }
 0x26e   :  { %1554 = vadd.xlane.f32.xlu1 %v1553_v4 }
 0x27b   :  { %v1462_v33 = vpop.xlane.xlu0 %1461 }
 0x27c   :  { %v1558_v35 = vadd.f32 %v5600_v62, %v1462_v33 }
 0x27e   :  { %v1625_v48 = vrot.slane %v1558_v35, %v6520_v30  ;;  %v1629_v5 = vrot.slane %v1558_v35, %v6521_v57  ;;  %v1633_v36 = vrot.slane %v1558_v35, %v5603_v56  ;;  %v1637_v17 = vrot.slane %v1558_v35, %v5606_v15 }
 0x27f   :  { %v1465_v22 = vpop.xlane.xlu0 %1464  ;;  %v1641_v6 = vrot.slane %v1558_v35, %v5609_v0  ;;  %v1645_v38 = vrot.slane %v1558_v35, %v5612_v34  ;;  %v1649_v37 = vrot.slane %v1558_v35, %v5615_v54  ;;  %v1653_v18 = vrot.slane %v1558_v35, %v5618_v16 }
 0x280   :  { %v1559_v60 = vadd.f32 %v5600_v62, %v1465_v22  ;;  %v2646_v39 = vcombine.low %v1625_v48, %v1629_v5  ;;  %v2647_v55 = vcombine.low %v1633_v36, %v1637_v17 }
 0x281   :  { %v2648_v59 = vcombine.low %v1641_v6, %v1645_v38  ;;  %v2649_v20 = vcombine.low %v1649_v37, %v1653_v18 }
 0x282   :  { %v2656_v41 = vrot.slane %v2646_v39, %v5622_v28  ;;  %v2663_v7 = vrot.slane %v2647_v55, %v5622_v28  ;;  %v1657_v3 = vrot.slane %v1559_v60, %v6520_v30  ;;  %v1661_v25 = vrot.slane %v1559_v60, %v6521_v57 }
 0x283   :  { %v1468_v42 = vpop.xlane.xlu1 %1467  ;;  %v2670_v21 = vrot.slane %v2648_v59, %v5622_v28  ;;  %v2677_v8 = vrot.slane %v2649_v20, %v5622_v28  ;;  %v1665_v61 = vrot.slane %v1559_v60, %v5603_v56  ;;  %v1669_v44 = vrot.slane %v1559_v60, %v5606_v15 }
 0x284   :  { %v1560_v58 = vadd.f32 %v5600_v62, %v1468_v42  ;;  %v2678_v23 = vcombine.low %v2656_v41, %v2663_v7  ;;  %v1673_v11 = vrot.slane %v1559_v60, %v5609_v0  ;;  %v1677_v45 = vrot.slane %v1559_v60, %v5612_v34 }
 0x285   :  { %v2679_v52 = vcombine.low %v2670_v21, %v2677_v8  ;;  %v1681_v43 = vrot.slane %v1559_v60, %v5615_v54  ;;  %v1685_v24 = vrot.slane %v1559_v60, %v5618_v16  ;;  %v2695_v9 = vcombine.low %v1657_v3, %v1661_v25 }
 0x286   :  { %v2686_v47 = vrot.slane %v2678_v23, %v5622_v28  ;;  %v2696_v19 = vcombine.low %v1665_v61, %v1669_v44  ;;  %v2697_v53 = vcombine.low %v1673_v11, %v1677_v45  ;;  %v1689_v26 = vrot.slane %v1560_v58, %v6520_v30 }
 0x287   :  { %v1471_v49 = vpop.xlane.xlu1 %1470  ;;  %v2693_v46 = vrot.slane %v2679_v52, %v5622_v28  ;;  %v2698_v10 = vcombine.low %v1681_v43, %v1685_v24  ;;  %v2705_v63 = vrot.slane %v2695_v9, %v5622_v28  ;;  %v1693_v27 = vrot.slane %v1560_v58, %v6521_v57 }
 0x288   :  { %v1561_v40 = vadd.f32 %v5600_v62, %v1471_v49  ;;  %v2712_v51 = vrot.slane %v2696_v19, %v5622_v28  ;;  %v2719_v14 = vrot.slane %v2697_v53, %v5622_v28  ;;  %v1697_v12 = vrot.slane %v1560_v58, %v5603_v56 }
 0x289   :  { %v2694_v29 = vcombine.low %v2686_v47, %v2693_v46  ;;  %v2726_v2 = vrot.slane %v2698_v10, %v5622_v28  ;;  %v1701_v31 = vrot.slane %v1560_v58, %v5606_v15  ;;  %v1705_v4 = vrot.slane %v1560_v58, %v5609_v0 }
 0x28a   :  { %v2727_v13 = vcombine.low %v2705_v63, %v2712_v51  ;;  %v1709_v32 = vrot.slane %v1560_v58, %v5612_v34  ;;  %v1713_v1 = vrot.slane %v1560_v58, %v5615_v54  ;;  %v1717_v33 = vrot.slane %v1560_v58, %v5618_v16 }
 0x28b   :  { %4215 = vperm.xlu0 %4602, %v2694_v29   ;;  %v1474_v35 = vpop.xlane.xlu0 %1473  ;;  %v2728_v48 = vcombine.low %v2719_v14, %v2726_v2  ;;  %v2744_v5 = vcombine.low %v1689_v26, %v1693_v27  ;;  %v2745_v36 = vcombine.low %v1697_v12, %v1701_v31  ;;  %v1721_v17 = vrot.slane %v1561_v40, %v6520_v30 }
 0x28c   :  { %v1562_v22 = vadd.f32 %v5600_v62, %v1474_v35  ;;  %v2735_v6 = vrot.slane %v2727_v13, %v5622_v28  ;;  %v2746_v38 = vcombine.low %v1705_v4, %v1709_v32  ;;  %v2747_v37 = vcombine.low %v1713_v1, %v1717_v33 }
 0x28d   :  { %v2742_v18 = vrot.slane %v2728_v48, %v5622_v28  ;;  %v2754_v60 = vrot.slane %v2744_v5, %v5622_v28  ;;  %v2761_v39 = vrot.slane %v2745_v36, %v5622_v28  ;;  %v1725_v55 = vrot.slane %v1561_v40, %v6521_v57 }
 0x28e   :  { %v2768_v59 = vrot.slane %v2746_v38, %v5622_v28  ;;  %v2775_v20 = vrot.slane %v2747_v37, %v5622_v28  ;;  %v1729_v41 = vrot.slane %v1561_v40, %v5603_v56  ;;  %v1733_v7 = vrot.slane %v1561_v40, %v5606_v15 }
 0x28f   :  { %v2743_v3 = vcombine.low %v2735_v6, %v2742_v18  ;;  %v1477_v25 = vpop.xlane.xlu1 %1476  ;;  %v2776_v42 = vcombine.low %v2754_v60, %v2761_v39  ;;  %v1737_v21 = vrot.slane %v1561_v40, %v5609_v0  ;;  %v1741_v8 = vrot.slane %v1561_v40, %v5612_v34 }
 0x290   :  { %v1563_v61 = vadd.f32 %v5600_v62, %v1477_v25  ;;  %v2777_v44 = vcombine.low %v2768_v59, %v2775_v20  ;;  %v1745_v58 = vrot.slane %v1561_v40, %v5615_v54  ;;  %v1749_v23 = vrot.slane %v1561_v40, %v5618_v16 }
 0x291   :  { %4218 = vperm.xlu1 %4603, %v2743_v3   ;;  %v2784_v11 = vrot.slane %v2776_v42, %v5622_v28  ;;  %v2793_v45 = vcombine.low %v1721_v17, %v1725_v55  ;;  %v2794_v52 = vcombine.low %v1729_v41, %v1733_v7  ;;  %v2795_v43 = vcombine.low %v1737_v21, %v1741_v8 }
 0x292   :  { %v2791_v24 = vrot.slane %v2777_v44, %v5622_v28  ;;  %v2796_v9 = vcombine.low %v1745_v58, %v1749_v23  ;;  %v1753_v47 = vrot.slane %v1562_v22, %v6520_v30  ;;  %v1757_v19 = vrot.slane %v1562_v22, %v6521_v57 }
 0x293   :  { %v1480_v53 = vpop.xlane.xlu0 %1479  ;;  %v2803_v26 = vrot.slane %v2793_v45, %v5622_v28  ;;  %v2810_v49 = vrot.slane %v2794_v52, %v5622_v28  ;;  %v2817_v46 = vrot.slane %v2795_v43, %v5622_v28  ;;  %v1761_v10 = vrot.slane %v1562_v22, %v5603_v56 }
 0x294   :  { %v2792_v63 = vcombine.low %v2784_v11, %v2791_v24  ;;  %v5686_v27 = vadd.f32 %v5600_v62, %v1480_v53  ;;  %v2824_v40 = vrot.slane %v2796_v9, %v5622_v28  ;;  %v1765_v51 = vrot.slane %v1562_v22, %v5606_v15 }
 0x295   :  { %v2825_v14 = vcombine.low %v2803_v26, %v2810_v49  ;;  %v1769_v12 = vrot.slane %v1562_v22, %v5609_v0  ;;  %v1773_v29 = vrot.slane %v1562_v22, %v5612_v34  ;;  %v1777_v2 = vrot.slane %v1562_v22, %v5615_v54 }
 0x296   :  { %4221 = vperm.xlu1 %4603, %v2792_v63   ;;  %v2826_v31 = vcombine.low %v2817_v46, %v2824_v40  ;;  %v1781_v4 = vrot.slane %v1562_v22, %v5618_v16  ;;  %v2842_v13 = vcombine.low %v1753_v47, %v1757_v19  ;;  %v2843_v32 = vcombine.low %v1761_v10, %v1765_v51 }
 0x297   :  { %v2833_v1 = vrot.slane %v2825_v14, %v5622_v28  ;;  %v1483_v33 = vpop.xlane.xlu1 %1482  ;;  %v2844_v35 = vcombine.low %v1769_v12, %v1773_v29  ;;  %v1785_v48 = vrot.slane %v1563_v61, %v6520_v30  ;;  %v1789_v5 = vrot.slane %v1563_v61, %v6521_v57 }
 0x298   :  { %v2840_v36 = vrot.slane %v2826_v31, %v5622_v28  ;;  %v5699_v17 = vadd.f32 %v5600_v62, %v1483_v33  ;;  %v2845_v6 = vcombine.low %v1777_v2, %v1781_v4  ;;  %v2852_v38 = vrot.slane %v2842_v13, %v5622_v28 }
 0x299   :  { %v2859_v22 = vrot.slane %v2843_v32, %v5622_v28  ;;  %v2866_v37 = vrot.slane %v2844_v35, %v5622_v28  ;;  %v1793_v18 = vrot.slane %v1563_v61, %v5603_v56  ;;  %v1797_v60 = vrot.slane %v1563_v61, %v5606_v15 }
 0x29a   :  { %v2841_v39 = vcombine.low %v2833_v1, %v2840_v36  ;;  %v2873_v55 = vrot.slane %v2845_v6, %v5622_v28  ;;  %v1801_v59 = vrot.slane %v1563_v61, %v5609_v0  ;;  %v1805_v20 = vrot.slane %v1563_v61, %v5612_v34 }
 0x29b   :  { %v2874_v41 = vcombine.low %v2852_v38, %v2859_v22  ;;  %v1486_v7 = vpop.xlane.xlu0 %1485  ;;  %v1809_v3 = vrot.slane %v1563_v61, %v5615_v54  ;;  %v1813_v25 = vrot.slane %v1563_v61, %v5618_v16  ;;  %v2891_v42 = vcombine.low %v1785_v48, %v1789_v5 }
 0x29c   :  { %4224 = vperm.xlu1 %4603, %v2841_v39   ;;  %v2875_v21 = vcombine.low %v2866_v37, %v2873_v55  ;;  %v5712_v8 = vadd.f32 %v5600_v62, %v1486_v7  ;;  %v2892_v44 = vcombine.low %v1793_v18, %v1797_v60  ;;  %v2893_v58 = vcombine.low %v1801_v59, %v1805_v20 }
 0x29d   :  { %v2882_v23 = vrot.slane %v2874_v41, %v5622_v28  ;;  %v2894_v11 = vcombine.low %v1809_v3, %v1813_v25  ;;  %v2901_v45 = vrot.slane %v2891_v42, %v5622_v28  ;;  %v1817_v52 = vrot.slane %v5686_v27, %v6520_v30 }
 0x29e   :  { %v2889_v43 = vrot.slane %v2875_v21, %v5622_v28  ;;  %v2908_v61 = vrot.slane %v2892_v44, %v5622_v28  ;;  %v2915_v24 = vrot.slane %v2893_v58, %v5622_v28  ;;  %v1821_v9 = vrot.slane %v5686_v27, %v6521_v57 }
 0x29f   :  { %v2922_v47 = vrot.slane %v2894_v11, %v5622_v28  ;;  %v1489_v19 = vpop.xlane.xlu1 %1488  ;;  %v1825_v53 = vrot.slane %v5686_v27, %v5603_v56  ;;  %v1829_v26 = vrot.slane %v5686_v27, %v5606_v15  ;;  %v1833_v49 = vrot.slane %v5686_v27, %v5609_v0 }
 0x2a0   :  { %v2890_v46 = vcombine.low %v2882_v23, %v2889_v43  ;;  %v2923_v10 = vcombine.low %v2901_v45, %v2908_v61  ;;  %v5731_v63 = vadd.f32 %v5600_v62, %v1489_v19  ;;  %v1837_v40 = vrot.slane %v5686_v27, %v5612_v34 }
 0x2a1   :  { %v2924_v51 = vcombine.low %v2915_v24, %v2922_v47  ;;  %v1841_v14 = vrot.slane %v5686_v27, %v5615_v54  ;;  %v1845_v12 = vrot.slane %v5686_v27, %v5618_v16  ;;  %v2940_v29 = vcombine.low %v1817_v52, %v1821_v9 }
 0x2a2   :  { %4227 = vperm.xlu1 %4603, %v2890_v46   ;;  %v2931_v2 = vrot.slane %v2923_v10, %v5622_v28  ;;  %v2941_v31 = vcombine.low %v1825_v53, %v1829_v26  ;;  %v2942_v4 = vcombine.low %v1833_v49, %v1837_v40  ;;  %v1849_v13 = vrot.slane %v5699_v17, %v6520_v30 }
 0x2a3   :  { %v2938_v32 = vrot.slane %v2924_v51, %v5622_v28  ;;  %v2943_v1 = vcombine.low %v1841_v14, %v1845_v12  ;;  %v2950_v33 = vrot.slane %v2940_v29, %v5622_v28  ;;  %v1492_v35 = vpop.xlane.xlu0 %1491  ;;  %v1853_v48 = vrot.slane %v5699_v17, %v6521_v57 }
 0x2a4   :  { %v2957_v27 = vrot.slane %v2941_v31, %v5622_v28  ;;  %v2964_v5 = vrot.slane %v2942_v4, %v5622_v28  ;;  %v5749_v36 = vadd.f32 %v5600_v62, %v1492_v35  ;;  %v1857_v6 = vrot.slane %v5699_v17, %v5603_v56 }
 0x2a5   :  { %v2939_v38 = vcombine.low %v2931_v2, %v2938_v32  ;;  %v2971_v22 = vrot.slane %v2943_v1, %v5622_v28  ;;  %v1861_v37 = vrot.slane %v5699_v17, %v5606_v15  ;;  %v1865_v18 = vrot.slane %v5699_v17, %v5609_v0 }
 0x2a6   :  { %v2972_v60 = vcombine.low %v2950_v33, %v2957_v27  ;;  %v1869_v39 = vrot.slane %v5699_v17, %v5612_v34  ;;  %v1873_v55 = vrot.slane %v5699_v17, %v5615_v54  ;;  %v1877_v59 = vrot.slane %v5699_v17, %v5618_v16 }
 0x2a7   :  { %4230 = vperm.xlu1 %4603, %v2939_v38   ;;  %v2973_v20 = vcombine.low %v2964_v5, %v2971_v22  ;;  %v2989_v41 = vcombine.low %v1849_v13, %v1853_v48  ;;  %v2990_v7 = vcombine.low %v1857_v6, %v1861_v37  ;;  %v1495_v3 = vpop.xlane.xlu1 %1494  ;;  %v1881_v25 = vrot.slane %v5712_v8, %v6520_v30 }
 0x2a8   :  { %v2980_v42 = vrot.slane %v2972_v60, %v5622_v28  ;;  %v2991_v21 = vcombine.low %v1865_v18, %v1869_v39  ;;  %v2992_v44 = vcombine.low %v1873_v55, %v1877_v59  ;;  %v5768_v58 = vadd.f32 %v5600_v62, %v1495_v3 }
 0x2a9   :  { %v2987_v23 = vrot.slane %v2973_v20, %v5622_v28  ;;  %v2999_v11 = vrot.slane %v2989_v41, %v5622_v28  ;;  %v3006_v17 = vrot.slane %v2990_v7, %v5622_v28  ;;  %v1885_v45 = vrot.slane %v5712_v8, %v6521_v57 }
 0x2aa   :  { %v3013_v52 = vrot.slane %v2991_v21, %v5622_v28  ;;  %v3020_v43 = vrot.slane %v2992_v44, %v5622_v28  ;;  %v1889_v61 = vrot.slane %v5712_v8, %v5603_v56  ;;  %v1893_v24 = vrot.slane %v5712_v8, %v5606_v15 }
 0x2ab   :  { %v2988_v9 = vcombine.low %v2980_v42, %v2987_v23  ;;  %v3021_v47 = vcombine.low %v2999_v11, %v3006_v17  ;;  %v1897_v19 = vrot.slane %v5712_v8, %v5609_v0  ;;  %v1901_v53 = vrot.slane %v5712_v8, %v5612_v34  ;;  %v1498_v26 = vpop.xlane.xlu0 %1497 }
 0x2ac   :  { %v3022_v49 = vcombine.low %v3013_v52, %v3020_v43  ;;  %v1905_v46 = vrot.slane %v5712_v8, %v5615_v54  ;;  %v1909_v10 = vrot.slane %v5712_v8, %v5618_v16  ;;  %v3038_v40 = vcombine.low %v1881_v25, %v1885_v45 }
 0x2ad   :  { %4233 = vperm.xlu1 %4603, %v2988_v9   ;;  %v3029_v51 = vrot.slane %v3021_v47, %v5622_v28  ;;  %v3039_v14 = vcombine.low %v1889_v61, %v1893_v24  ;;  %v3040_v12 = vcombine.low %v1897_v19, %v1901_v53  ;;  %v5791_v29 = vadd.f32 %v5600_v62, %v1498_v26 }
 0x2ae   :  { %v3036_v2 = vrot.slane %v3022_v49, %v5622_v28  ;;  %v3041_v31 = vcombine.low %v1905_v46, %v1909_v10  ;;  %v3048_v4 = vrot.slane %v3038_v40, %v5622_v28  ;;  %v1913_v13 = vrot.slane %v5731_v63, %v6520_v30 }
 0x2af   :  { %v3055_v32 = vrot.slane %v3039_v14, %v5622_v28  ;;  %v3062_v8 = vrot.slane %v3040_v12, %v5622_v28  ;;  %v1917_v1 = vrot.slane %v5731_v63, %v6521_v57  ;;  %v1921_v33 = vrot.slane %v5731_v63, %v5603_v56  ;;  %v1501_v35 = vpop.xlane.xlu1 %1500 }
 0x2b0   :  { %v3037_v48 = vcombine.low %v3029_v51, %v3036_v2  ;;  %v3069_v27 = vrot.slane %v3041_v31, %v5622_v28  ;;  %v1925_v5 = vrot.slane %v5731_v63, %v5606_v15  ;;  %v1929_v6 = vrot.slane %v5731_v63, %v5609_v0 }
 0x2b1   :  { %v3070_v38 = vcombine.low %v3048_v4, %v3055_v32  ;;  %v1933_v22 = vrot.slane %v5731_v63, %v5612_v34  ;;  %v1937_v37 = vrot.slane %v5731_v63, %v5615_v54  ;;  %v1941_v18 = vrot.slane %v5731_v63, %v5618_v16 }
 0x2b2   :  { %4236 = vperm.xlu1 %4603, %v3037_v48   ;;  %v3071_v60 = vcombine.low %v3062_v8, %v3069_v27  ;;  %v3087_v39 = vcombine.low %v1913_v13, %v1917_v1  ;;  %v3088_v55 = vcombine.low %v1921_v33, %v1925_v5  ;;  %v5815_v59 = vadd.f32 %v5600_v62, %v1501_v35 }
 0x2b3   :  { %v3078_v20 = vrot.slane %v3070_v38, %v5622_v28  ;;  %v3089_v41 = vcombine.low %v1929_v6, %v1933_v22  ;;  %v3090_v7 = vcombine.low %v1937_v37, %v1941_v18  ;;  %v1945_v3 = vrot.slane %v5749_v36, %v6520_v30  ;;  %v1504_v45 = vpop.xlane.xlu0 %1503 }
 0x2b4   :  { %v3085_v25 = vrot.slane %v3071_v60, %v5622_v28  ;;  %v3097_v42 = vrot.slane %v3087_v39, %v5622_v28  ;;  %v3104_v63 = vrot.slane %v3088_v55, %v5622_v28  ;;  %v1949_v21 = vrot.slane %v5749_v36, %v6521_v57 }
 0x2b5   :  { %v3111_v44 = vrot.slane %v3089_v41, %v5622_v28  ;;  %v3118_v23 = vrot.slane %v3090_v7, %v5622_v28  ;;  %v1953_v11 = vrot.slane %v5749_v36, %v5603_v56  ;;  %v1957_v17 = vrot.slane %v5749_v36, %v5606_v15 }
 0x2b6   :  { %v3086_v52 = vcombine.low %v3078_v20, %v3085_v25  ;;  %v3119_v43 = vcombine.low %v3097_v42, %v3104_v63  ;;  %v1961_v61 = vrot.slane %v5749_v36, %v5609_v0  ;;  %v1965_v24 = vrot.slane %v5749_v36, %v5612_v34 }
 0x2b7   :  { %v3120_v9 = vcombine.low %v3111_v44, %v3118_v23  ;;  %v1969_v47 = vrot.slane %v5749_v36, %v5615_v54  ;;  %v1973_v19 = vrot.slane %v5749_v36, %v5618_v16  ;;  %v3136_v53 = vcombine.low %v1945_v3, %v1949_v21  ;;  %v1507_v13 = vpop.xlane.xlu1 %1506 }
 0x2b8   :  { %4239 = vperm.xlu1 %4603, %v3086_v52   ;;  %v3127_v26 = vrot.slane %v3119_v43, %v5622_v28  ;;  %v3137_v49 = vcombine.low %v1953_v11, %v1957_v17  ;;  %v3138_v46 = vcombine.low %v1961_v61, %v1965_v24  ;;  %v5841_v10 = vadd.f32 %v5600_v62, %v1504_v45 }
 0x2b9   :  { %v3134_v40 = vrot.slane %v3120_v9, %v5622_v28  ;;  %v3139_v51 = vcombine.low %v1969_v47, %v1973_v19  ;;  %v3146_v14 = vrot.slane %v3136_v53, %v5622_v28  ;;  %v1977_v12 = vrot.slane %v5768_v58, %v6520_v30 }
 0x2ba   :  { %v3153_v2 = vrot.slane %v3137_v49, %v5622_v28  ;;  %v3160_v36 = vrot.slane %v3138_v46, %v5622_v28  ;;  %v1981_v31 = vrot.slane %v5768_v58, %v6521_v57  ;;  %v1985_v4 = vrot.slane %v5768_v58, %v5603_v56 }
 0x2bb   :  { %v3135_v32 = vcombine.low %v3127_v26, %v3134_v40  ;;  %v3167_v8 = vrot.slane %v3139_v51, %v5622_v28  ;;  %v1989_v1 = vrot.slane %v5768_v58, %v5606_v15  ;;  %v1993_v33 = vrot.slane %v5768_v58, %v5609_v0  ;;  %v1510_v21 = vpop.xlane.xlu0 %1509 }
 0x2bc   :  { %v3168_v35 = vcombine.low %v3146_v14, %v3153_v2  ;;  %v1997_v48 = vrot.slane %v5768_v58, %v5612_v34  ;;  %v2001_v27 = vrot.slane %v5768_v58, %v5615_v54  ;;  %v2005_v5 = vrot.slane %v5768_v58, %v5618_v16 }
 0x2bd   :  { %4242 = vperm.xlu0 %4602, %v3135_v32   ;;  %v3169_v6 = vcombine.low %v3160_v36, %v3167_v8  ;;  %v3185_v38 = vcombine.low %v1977_v12, %v1981_v31  ;;  %v3186_v22 = vcombine.low %v1985_v4, %v1989_v1  ;;  %v5865_v37 = vadd.f32 %v5600_v62, %v1507_v13 }
 0x2be   :  { %v3176_v18 = vrot.slane %v3168_v35, %v5622_v28  ;;  %v3187_v60 = vcombine.low %v1993_v33, %v1997_v48  ;;  %v3188_v39 = vcombine.low %v2001_v27, %v2005_v5  ;;  %v2009_v55 = vrot.slane %v5791_v29, %v6520_v30 }
 0x2bf   :  { %v3183_v20 = vrot.slane %v3169_v6, %v5622_v28  ;;  %v3195_v41 = vrot.slane %v3185_v38, %v5622_v28  ;;  %v3202_v58 = vrot.slane %v3186_v22, %v5622_v28  ;;  %v2013_v7 = vrot.slane %v5791_v29, %v6521_v57  ;;  %v1513_v53 = vpop.xlane.xlu1 %1512 }
 0x2c0   :  { %v3209_v3 = vrot.slane %v3187_v60, %v5622_v28  ;;  %v3216_v25 = vrot.slane %v3188_v39, %v5622_v28  ;;  %v2017_v42 = vrot.slane %v5791_v29, %v5603_v56  ;;  %v2021_v63 = vrot.slane %v5791_v29, %v5606_v15 }
 0x2c1   :  { %v3184_v44 = vcombine.low %v3176_v18, %v3183_v20  ;;  %v3217_v23 = vcombine.low %v3195_v41, %v3202_v58  ;;  %v2025_v11 = vrot.slane %v5791_v29, %v5609_v0  ;;  %v2029_v17 = vrot.slane %v5791_v29, %v5612_v34 }
 0x2c2   :  { %v3218_v45 = vcombine.low %v3209_v3, %v3216_v25  ;;  %v2033_v52 = vrot.slane %v5791_v29, %v5615_v54  ;;  %v2037_v43 = vrot.slane %v5791_v29, %v5618_v16  ;;  %v3234_v61 = vcombine.low %v2009_v55, %v2013_v7 }
 0x2c3   :  { %4245 = vperm.xlu1 %4603, %v3184_v44   ;;  %v3225_v24 = vrot.slane %v3217_v23, %v5622_v28  ;;  %v3235_v9 = vcombine.low %v2017_v42, %v2021_v63  ;;  %v3236_v47 = vcombine.low %v2025_v11, %v2029_v17  ;;  %v1574_v19 = vadd.f32 %v5600_v62, %v1510_v21  ;;  %v1516_v13 = vpop.xlane.xlu0 %1515 }
 0x2c4   :  { %v3232_v26 = vrot.slane %v3218_v45, %v5622_v28  ;;  %v3237_v49 = vcombine.low %v2033_v52, %v2037_v43  ;;  %v3244_v46 = vrot.slane %v3234_v61, %v5622_v28  ;;  %v2041_v40 = vrot.slane %v5815_v59, %v6520_v30 }
 0x2c5   :  { %v3251_v51 = vrot.slane %v3235_v9, %v5622_v28  ;;  %v3258_v29 = vrot.slane %v3236_v47, %v5622_v28  ;;  %v2045_v14 = vrot.slane %v5815_v59, %v6521_v57  ;;  %v2049_v12 = vrot.slane %v5815_v59, %v5603_v56 }
 0x2c6   :  { %v3233_v2 = vcombine.low %v3225_v24, %v3232_v26  ;;  %v3265_v36 = vrot.slane %v3237_v49, %v5622_v28  ;;  %v2053_v31 = vrot.slane %v5815_v59, %v5606_v15  ;;  %v2057_v4 = vrot.slane %v5815_v59, %v5609_v0 }
 0x2c7   :  { %v3266_v32 = vcombine.low %v3244_v46, %v3251_v51  ;;  %v2061_v8 = vrot.slane %v5815_v59, %v5612_v34  ;;  %v2065_v1 = vrot.slane %v5815_v59, %v5615_v54  ;;  %v2069_v33 = vrot.slane %v5815_v59, %v5618_v16  ;;  %v1519_v35 = vpop.xlane.xlu1 %1518 }
 0x2c8   :  { %4248 = vperm.xlu1 %4603, %v3233_v2   ;;  %v3267_v48 = vcombine.low %v3258_v29, %v3265_v36  ;;  %v3283_v27 = vcombine.low %v2041_v40, %v2045_v14  ;;  %v3284_v5 = vcombine.low %v2049_v12, %v2053_v31  ;;  %v1575_v6 = vadd.f32 %v5600_v62, %v1513_v53 }
 0x2c9   :  { %v3274_v38 = vrot.slane %v3266_v32, %v5622_v28  ;;  %v3285_v22 = vcombine.low %v2057_v4, %v2061_v8  ;;  %v3286_v18 = vcombine.low %v2065_v1, %v2069_v33  ;;  %v5915_v60 = vadd.f32 %v5600_v62, %v1516_v13 }
 0x2ca   :  { %v3281_v39 = vrot.slane %v3267_v48, %v5622_v28  ;;  %v3293_v55 = vrot.slane %v3283_v27, %v5622_v28  ;;  %v3300_v59 = vrot.slane %v3284_v5, %v5622_v28  ;;  %v5921_v20 = vadd.f32 %v5600_v62, %v1519_v35 }
 0x2cb   :  { %v3307_v41 = vrot.slane %v3285_v22, %v5622_v28  ;;  %v3314_v58 = vrot.slane %v3286_v18, %v5622_v28  ;;  %v2137_v7 = vrot.slane %v1574_v19, %v6520_v30  ;;  %v2141_v3 = vrot.slane %v1574_v19, %v6521_v57  ;;  %v1522_v44 = vpop.xlane.xlu0 %1521 }
 0x2cc   :  { %v3282_v25 = vcombine.low %v3274_v38, %v3281_v39  ;;  %v3315_v42 = vcombine.low %v3293_v55, %v3300_v59  ;;  %v2145_v63 = vrot.slane %v1574_v19, %v5603_v56  ;;  %v2149_v21 = vrot.slane %v1574_v19, %v5606_v15 }
 0x2cd   :  { %v3316_v23 = vcombine.low %v3307_v41, %v3314_v58  ;;  %v2153_v11 = vrot.slane %v1574_v19, %v5609_v0  ;;  %v2157_v17 = vrot.slane %v1574_v19, %v5612_v34  ;;  %v2161_v45 = vrot.slane %v1574_v19, %v5615_v54 }
 0x2ce   :  { %4251 = vperm.xlu1 %4603, %v3282_v25   ;;  %v3323_v52 = vrot.slane %v3315_v42, %v5622_v28  ;;  %v2165_v43 = vrot.slane %v1574_v19, %v5618_v16  ;;  %v3430_v61 = vcombine.low %v2137_v7, %v2141_v3  ;;  %v3431_v24 = vcombine.low %v2145_v63, %v2149_v21 }
 0x2cf   :  { %v3330_v9 = vrot.slane %v3316_v23, %v5622_v28  ;;  %v3432_v47 = vcombine.low %v2153_v11, %v2157_v17  ;;  %v5936_v53 = vadd.f32 %v5600_v62, %v1522_v44  ;;  %v2169_v26 = vrot.slane %v1575_v6, %v6520_v30  ;;  %v1525_v2 = vpop.xlane.xlu1 %1524 }
 0x2d0   :  { %v3433_v49 = vcombine.low %v2161_v45, %v2165_v43  ;;  %v3440_v46 = vrot.slane %v3430_v61, %v5622_v28  ;;  %v3447_v40 = vrot.slane %v3431_v24, %v5622_v28  ;;  %v2173_v51 = vrot.slane %v1575_v6, %v6521_v57 }
 0x2d1   :  { %v3331_v29 = vcombine.low %v3323_v52, %v3330_v9  ;;  %v3454_v19 = vrot.slane %v3432_v47, %v5622_v28  ;;  %v2177_v14 = vrot.slane %v1575_v6, %v5603_v56  ;;  %v2181_v12 = vrot.slane %v1575_v6, %v5606_v15 }
 0x2d2   :  { %v3461_v36 = vrot.slane %v3433_v49, %v5622_v28  ;;  %v3462_v31 = vcombine.low %v3440_v46, %v3447_v40  ;;  %v2185_v4 = vrot.slane %v1575_v6, %v5609_v0  ;;  %v2189_v13 = vrot.slane %v1575_v6, %v5612_v34 }
 0x2d3   :  { %4254 = vperm.xlu1 %4603, %v3331_v29   ;;  %v2193_v32 = vrot.slane %v1575_v6, %v5615_v54  ;;  %v2197_v8 = vrot.slane %v1575_v6, %v5618_v16  ;;  %v3479_v1 = vcombine.low %v2169_v26, %v2173_v51  ;;  %v3480_v33 = vcombine.low %v2177_v14, %v2181_v12  ;;  %v1528_v42 = vpop.xlane.xlu0 %1527 }
 0x2d4   :  { %v3463_v35 = vcombine.low %v3454_v19, %v3461_v36  ;;  %v3470_v48 = vrot.slane %v3462_v31, %v5622_v28  ;;  %v3481_v27 = vcombine.low %v2185_v4, %v2189_v13  ;;  %v5952_v5 = vadd.f32 %v5600_v62, %v1525_v2 }
 0x2d5   :  { %v3482_v38 = vcombine.low %v2193_v32, %v2197_v8  ;;  %v3489_v22 = vrot.slane %v3479_v1, %v5622_v28  ;;  %v3496_v18 = vrot.slane %v3480_v33, %v5622_v28  ;;  %v2201_v39 = vrot.slane %v5915_v60, %v6520_v30 }
 0x2d6   :  { %v3477_v55 = vrot.slane %v3463_v35, %v5622_v28  ;;  %v3503_v6 = vrot.slane %v3481_v27, %v5622_v28  ;;  %v2205_v59 = vrot.slane %v5915_v60, %v6521_v57  ;;  %v2209_v41 = vrot.slane %v5915_v60, %v5603_v56 }
 0x2d7   :  { %v3510_v58 = vrot.slane %v3482_v38, %v5622_v28  ;;  %v3511_v7 = vcombine.low %v3489_v22, %v3496_v18  ;;  %v2213_v3 = vrot.slane %v5915_v60, %v5606_v15  ;;  %v2217_v25 = vrot.slane %v5915_v60, %v5609_v0  ;;  %v1531_v19 = vpop.xlane.xlu1 %1530 }
 0x2d8   :  { %v3478_v63 = vcombine.low %v3470_v48, %v3477_v55  ;;  %v2221_v21 = vrot.slane %v5915_v60, %v5612_v34  ;;  %v2225_v44 = vrot.slane %v5915_v60, %v5615_v54  ;;  %v2229_v23 = vrot.slane %v5915_v60, %v5618_v16 }
 0x2d9   :  { %v3512_v11 = vcombine.low %v3503_v6, %v3510_v58  ;;  %v3519_v17 = vrot.slane %v3511_v7, %v5622_v28  ;;  %v3528_v45 = vcombine.low %v2201_v39, %v2205_v59  ;;  %v3529_v52 = vcombine.low %v2209_v41, %v2213_v3 }
 0x2da   :  { %4263 = vperm.xlu0 %4602, %v3478_v63   ;;  %v3530_v43 = vcombine.low %v2217_v25, %v2221_v21  ;;  %v3531_v61 = vcombine.low %v2225_v44, %v2229_v23  ;;  %v5977_v24 = vadd.f32 %v5600_v62, %v1528_v42  ;;  %v2233_v9 = vrot.slane %v5921_v20, %v6520_v30 }
 0x2db   :  { %v3526_v47 = vrot.slane %v3512_v11, %v5622_v28  ;;  %v3538_v26 = vrot.slane %v3528_v45, %v5622_v28  ;;  %v3545_v60 = vrot.slane %v3529_v52, %v5622_v28  ;;  %v2237_v49 = vrot.slane %v5921_v20, %v6521_v57  ;;  %v1534_v6 = vpop.xlane.xlu0 %1533 }
 0x2dc   :  { %v3552_v46 = vrot.slane %v3530_v43, %v5622_v28  ;;  %v3559_v40 = vrot.slane %v3531_v61, %v5622_v28  ;;  %v2241_v51 = vrot.slane %v5921_v20, %v5603_v56  ;;  %v2245_v29 = vrot.slane %v5921_v20, %v5606_v15 }
 0x2dd   :  { %v3527_v14 = vcombine.low %v3519_v17, %v3526_v47  ;;  %v3560_v12 = vcombine.low %v3538_v26, %v3545_v60  ;;  %v2249_v2 = vrot.slane %v5921_v20, %v5609_v0  ;;  %v2253_v36 = vrot.slane %v5921_v20, %v5612_v34 }
 0x2de   :  { %v3561_v31 = vcombine.low %v3552_v46, %v3559_v40  ;;  %v2257_v4 = vrot.slane %v5921_v20, %v5615_v54  ;;  %v2261_v13 = vrot.slane %v5921_v20, %v5618_v16  ;;  %v3577_v32 = vcombine.low %v2233_v9, %v2237_v49 }
 0x2df   :  { %4266 = vperm.xlu1 %4603, %v3527_v14   ;;  %v3568_v8 = vrot.slane %v3560_v12, %v5622_v28  ;;  %v3578_v1 = vcombine.low %v2241_v51, %v2245_v29  ;;  %v3579_v33 = vcombine.low %v2249_v2, %v2253_v36  ;;  %v6002_v35 = vadd.f32 %v5600_v62, %v1531_v19  ;;  %v1537_v40 = vpop.xlane.xlu1 %1536 }
 0x2e0   :  { %v3575_v48 = vrot.slane %v3561_v31, %v5622_v28  ;;  %v3580_v27 = vcombine.low %v2257_v4, %v2261_v13  ;;  %v3587_v38 = vrot.slane %v3577_v32, %v5622_v28  ;;  %v2265_v22 = vrot.slane %v5936_v53, %v6520_v30 }
 0x2e1   :  { %v3594_v18 = vrot.slane %v3578_v1, %v5622_v28  ;;  %v3601_v20 = vrot.slane %v3579_v33, %v5622_v28  ;;  %v2269_v39 = vrot.slane %v5936_v53, %v6521_v57  ;;  %v2273_v55 = vrot.slane %v5936_v53, %v5603_v56 }
 0x2e2   :  { %v3576_v59 = vcombine.low %v3568_v8, %v3575_v48  ;;  %v3608_v41 = vrot.slane %v3580_v27, %v5622_v28  ;;  %v2277_v58 = vrot.slane %v5936_v53, %v5606_v15  ;;  %v2281_v7 = vrot.slane %v5936_v53, %v5609_v0 }
 0x2e3   :  { %v3609_v3 = vcombine.low %v3587_v38, %v3594_v18  ;;  %v2285_v25 = vrot.slane %v5936_v53, %v5612_v34  ;;  %v2289_v42 = vrot.slane %v5936_v53, %v5615_v54  ;;  %v2293_v63 = vrot.slane %v5936_v53, %v5618_v16 }
 0x2e4   :  { %4269 = vperm.xlu0 %4602, %v3576_v59   ;;  %v3610_v21 = vcombine.low %v3601_v20, %v3608_v41  ;;  %v3626_v44 = vcombine.low %v2265_v22, %v2269_v39  ;;  %v3627_v23 = vcombine.low %v2273_v55, %v2277_v58  ;;  %v6026_v11 = vadd.f32 %v5600_v62, %v1534_v6  ;;  %v1540_v20 = vpop.xlane.xlu0 %1539 }
 0x2e5   :  { %v3617_v17 = vrot.slane %v3609_v3, %v5622_v28  ;;  %v3628_v45 = vcombine.low %v2281_v7, %v2285_v25  ;;  %v3629_v52 = vcombine.low %v2289_v42, %v2293_v63  ;;  %v2297_v43 = vrot.slane %v5952_v5, %v6520_v30 }
 0x2e6   :  { %v3624_v61 = vrot.slane %v3610_v21, %v5622_v28  ;;  %v3636_v9 = vrot.slane %v3626_v44, %v5622_v28  ;;  %v3643_v53 = vrot.slane %v3627_v23, %v5622_v28  ;;  %v2301_v47 = vrot.slane %v5952_v5, %v6521_v57 }
 0x2e7   :  { %v3650_v26 = vrot.slane %v3628_v45, %v5622_v28  ;;  %v3657_v60 = vrot.slane %v3629_v52, %v5622_v28  ;;  %v2305_v49 = vrot.slane %v5952_v5, %v5603_v56  ;;  %v2309_v46 = vrot.slane %v5952_v5, %v5606_v15 }
 0x2e8   :  { %v3625_v51 = vcombine.low %v3617_v17, %v3624_v61  ;;  %v3658_v29 = vcombine.low %v3636_v9, %v3643_v53  ;;  %v2313_v19 = vrot.slane %v5952_v5, %v5609_v0  ;;  %v2317_v14 = vrot.slane %v5952_v5, %v5612_v34 }
 0x2e9   :  { %v3659_v12 = vcombine.low %v3650_v26, %v3657_v60  ;;  %v2321_v2 = vrot.slane %v5952_v5, %v5615_v54  ;;  %v2325_v36 = vrot.slane %v5952_v5, %v5618_v16  ;;  %v3675_v31 = vcombine.low %v2297_v43, %v2301_v47  ;;  %v1543_v60 = vpop.xlane.xlu1 %1542 }
 0x2ea   :  { %4272 = vperm.xlu1 %4603, %v3625_v51   ;;  %v3666_v4 = vrot.slane %v3658_v29, %v5622_v28  ;;  %v3676_v13 = vcombine.low %v2305_v49, %v2309_v46  ;;  %v3677_v32 = vcombine.low %v2313_v19, %v2317_v14  ;;  %v6052_v8 = vadd.f32 %v5600_v62, %v1537_v40 }
 0x2eb   :  { %v3673_v1 = vrot.slane %v3659_v12, %v5622_v28  ;;  %v3678_v33 = vcombine.low %v2321_v2, %v2325_v36  ;;  %v3685_v48 = vrot.slane %v3675_v31, %v5622_v28  ;;  %v2329_v27 = vrot.slane %v5977_v24, %v6520_v30 }
 0x2ec   :  { %v3692_v38 = vrot.slane %v3676_v13, %v5622_v28  ;;  %v3699_v5 = vrot.slane %v3677_v32, %v5622_v28  ;;  %v2333_v22 = vrot.slane %v5977_v24, %v6521_v57  ;;  %v2337_v18 = vrot.slane %v5977_v24, %v5603_v56 }
 0x2ed   :  { %v3674_v39 = vcombine.low %v3666_v4, %v3673_v1  ;;  %v3706_v55 = vrot.slane %v3678_v33, %v5622_v28  ;;  %v2341_v6 = vrot.slane %v5977_v24, %v5606_v15  ;;  %v2345_v59 = vrot.slane %v5977_v24, %v5609_v0 }
 0x2ee   :  { %v3707_v41 = vcombine.low %v3685_v48, %v3692_v38  ;;  %v2349_v58 = vrot.slane %v5977_v24, %v5612_v34  ;;  %v2353_v7 = vrot.slane %v5977_v24, %v5615_v54  ;;  %v2357_v3 = vrot.slane %v5977_v24, %v5618_v16 }
 0x2ef   :  { %4275 = vperm.xlu0 %4602, %v3674_v39   ;;  %v3708_v25 = vcombine.low %v3699_v5, %v3706_v55  ;;  %v3724_v42 = vcombine.low %v2329_v27, %v2333_v22  ;;  %v3725_v63 = vcombine.low %v2337_v18, %v2341_v6  ;;  %v6076_v21 = vadd.f32 %v5600_v62, %v1540_v20  ;;  %v1546_v5 = vpop.xlane.xlu0 %1545 }
 0x2f0   :  { %v3715_v44 = vrot.slane %v3707_v41, %v5622_v28  ;;  %v3726_v23 = vcombine.low %v2345_v59, %v2349_v58  ;;  %v3727_v17 = vcombine.low %v2353_v7, %v2357_v3  ;;  %v2361_v45 = vrot.slane %v6002_v35, %v6520_v30 }
 0x2f1   :  { %v3722_v52 = vrot.slane %v3708_v25, %v5622_v28  ;;  %v3734_v43 = vrot.slane %v3724_v42, %v5622_v28  ;;  %v3741_v24 = vrot.slane %v3725_v63, %v5622_v28  ;;  %v2365_v61 = vrot.slane %v6002_v35, %v6521_v57 }
 0x2f2   :  { %v3748_v9 = vrot.slane %v3726_v23, %v5622_v28  ;;  %v3755_v53 = vrot.slane %v3727_v17, %v5622_v28  ;;  %v2369_v47 = vrot.slane %v6002_v35, %v5603_v56  ;;  %v2373_v26 = vrot.slane %v6002_v35, %v5606_v15 }
 0x2f3   :  { %v3723_v49 = vcombine.low %v3715_v44, %v3722_v52  ;;  %v3756_v46 = vcombine.low %v3734_v43, %v3741_v24  ;;  %v2377_v40 = vrot.slane %v6002_v35, %v5609_v0  ;;  %v2381_v51 = vrot.slane %v6002_v35, %v5612_v34 }
 0x2f4   :  { %v3757_v29 = vcombine.low %v3748_v9, %v3755_v53  ;;  %v2385_v19 = vrot.slane %v6002_v35, %v5615_v54  ;;  %v2389_v14 = vrot.slane %v6002_v35, %v5618_v16  ;;  %v3773_v12 = vcombine.low %v2361_v45, %v2365_v61  ;;  %v1549_v53 = vpop.xlane.xlu1 %1548 }
 0x2f5   :  { %4278 = vperm.xlu1 %4603, %v3723_v49   ;;  %v3764_v2 = vrot.slane %v3756_v46, %v5622_v28  ;;  %v3774_v36 = vcombine.low %v2369_v47, %v2373_v26  ;;  %v3775_v31 = vcombine.low %v2377_v40, %v2381_v51  ;;  %v6102_v4 = vadd.f32 %v5600_v62, %v1543_v60 }
 0x2f6   :  { %v3771_v13 = vrot.slane %v3757_v29, %v5622_v28  ;;  %v3776_v32 = vcombine.low %v2385_v19, %v2389_v14  ;;  %v3783_v1 = vrot.slane %v3773_v12, %v5622_v28  ;;  %v2393_v33 = vrot.slane %v6026_v11, %v6520_v30 }
 0x2f7   :  { %v3790_v48 = vrot.slane %v3774_v36, %v5622_v28  ;;  %v3797_v35 = vrot.slane %v3775_v31, %v5622_v28  ;;  %v2397_v27 = vrot.slane %v6026_v11, %v6521_v57  ;;  %v2401_v38 = vrot.slane %v6026_v11, %v5603_v56 }
 0x2f8   :  { %v3772_v22 = vcombine.low %v3764_v2, %v3771_v13  ;;  %v3804_v18 = vrot.slane %v3776_v32, %v5622_v28  ;;  %v2405_v20 = vrot.slane %v6026_v11, %v5606_v15  ;;  %v2409_v39 = vrot.slane %v6026_v11, %v5609_v0 }
 0x2f9   :  { %v3805_v55 = vcombine.low %v3783_v1, %v3790_v48  ;;  %v2413_v6 = vrot.slane %v6026_v11, %v5612_v34  ;;  %v2417_v59 = vrot.slane %v6026_v11, %v5615_v54  ;;  %v2421_v41 = vrot.slane %v6026_v11, %v5618_v16 }
 0x2fa   :  { %4281 = vperm.xlu0 %4602, %v3772_v22   ;;  %v3806_v58 = vcombine.low %v3797_v35, %v3804_v18  ;;  %v3822_v7 = vcombine.low %v2393_v33, %v2397_v27  ;;  %v3823_v3 = vcombine.low %v2401_v38, %v2405_v20  ;;  %v6126_v25 = vadd.f32 %v5600_v62, %v1546_v5 }
 0x2fb   :  { %v3813_v42 = vrot.slane %v3805_v55, %v5622_v28  ;;  %v3824_v63 = vcombine.low %v2409_v39, %v2413_v6  ;;  %v3825_v44 = vcombine.low %v2417_v59, %v2421_v41  ;;  %v2425_v23 = vrot.slane %v6052_v8, %v6520_v30 }
 0x2fc   :  { %v3820_v17 = vrot.slane %v3806_v58, %v5622_v28  ;;  %v3832_v45 = vrot.slane %v3822_v7, %v5622_v28  ;;  %v3839_v11 = vrot.slane %v3823_v3, %v5622_v28  ;;  %v2429_v52 = vrot.slane %v6052_v8, %v6521_v57 }
 0x2fd   :  { %v3846_v43 = vrot.slane %v3824_v63, %v5622_v28  ;;  %v3853_v24 = vrot.slane %v3825_v44, %v5622_v28  ;;  %v2433_v61 = vrot.slane %v6052_v8, %v5603_v56  ;;  %v2437_v9 = vrot.slane %v6052_v8, %v5606_v15 }
 0x2fe   :  { %v3821_v47 = vcombine.low %v3813_v42, %v3820_v17  ;;  %v3854_v26 = vcombine.low %v3832_v45, %v3839_v11  ;;  %v2441_v60 = vrot.slane %v6052_v8, %v5609_v0  ;;  %v2445_v49 = vrot.slane %v6052_v8, %v5612_v34 }
 0x2ff   :  { %v3855_v46 = vcombine.low %v3846_v43, %v3853_v24  ;;  %v2449_v40 = vrot.slane %v6052_v8, %v5615_v54  ;;  %v2453_v51 = vrot.slane %v6052_v8, %v5618_v16  ;;  %v3871_v29 = vcombine.low %v2425_v23, %v2429_v52  ;;  %v1552_v43 = vpop.xlane.xlu0 %1551 }
 0x300   :  { %4284 = vperm.xlu1 %4603, %v3821_v47   ;;  %v3862_v19 = vrot.slane %v3854_v26, %v5622_v28  ;;  %v3872_v14 = vcombine.low %v2433_v61, %v2437_v9  ;;  %v3873_v12 = vcombine.low %v2441_v60, %v2445_v49  ;;  %v6152_v2 = vadd.f32 %v5600_v62, %v1549_v53 }
 0x301   :  { %v3869_v36 = vrot.slane %v3855_v46, %v5622_v28  ;;  %v3874_v31 = vcombine.low %v2449_v40, %v2453_v51  ;;  %v3881_v13 = vrot.slane %v3871_v29, %v5622_v28  ;;  %v2073_v32 = vrot.slane %v5841_v10, %v6520_v30 }
 0x302   :  { %v3888_v1 = vrot.slane %v3872_v14, %v5622_v28  ;;  %v3895_v8 = vrot.slane %v3873_v12, %v5622_v28  ;;  %v2077_v33 = vrot.slane %v5841_v10, %v6521_v57  ;;  %v2081_v48 = vrot.slane %v5841_v10, %v5603_v56 }
 0x303   :  { %v3870_v35 = vcombine.low %v3862_v19, %v3869_v36  ;;  %v3902_v27 = vrot.slane %v3874_v31, %v5622_v28  ;;  %v2085_v38 = vrot.slane %v5841_v10, %v5606_v15  ;;  %v2089_v5 = vrot.slane %v5841_v10, %v5609_v0 }
 0x304   :  { %v3903_v22 = vcombine.low %v3881_v13, %v3888_v1  ;;  %v2093_v18 = vrot.slane %v5841_v10, %v5612_v34  ;;  %v2097_v20 = vrot.slane %v5841_v10, %v5615_v54  ;;  %v2101_v39 = vrot.slane %v5841_v10, %v5618_v16 }
 0x305   :  { %4287 = vperm.xlu0 %4602, %v3870_v35   ;;  %v3904_v55 = vcombine.low %v3895_v8, %v3902_v27  ;;  %v3332_v6 = vcombine.low %v2073_v32, %v2077_v33  ;;  %v3333_v59 = vcombine.low %v2081_v48, %v2085_v38  ;;  %v2457_v41 = vrot.slane %v6076_v21, %v6520_v30 }
 0x306   :  { %v3911_v58 = vrot.slane %v3903_v22, %v5622_v28  ;;  %v3334_v7 = vcombine.low %v2089_v5, %v2093_v18  ;;  %v3335_v3 = vcombine.low %v2097_v20, %v2101_v39  ;;  %v2461_v42 = vrot.slane %v6076_v21, %v6521_v57 }
 0x307   :  { %v3918_v63 = vrot.slane %v3904_v55, %v5622_v28  ;;  %v3342_v44 = vrot.slane %v3332_v6, %v5622_v28  ;;  %v3349_v10 = vrot.slane %v3333_v59, %v5622_v28  ;;  %v2465_v23 = vrot.slane %v6076_v21, %v5603_v56 }
 0x308   :  { %v3356_v17 = vrot.slane %v3334_v7, %v5622_v28  ;;  %v3363_v45 = vrot.slane %v3335_v3, %v5622_v28  ;;  %v2469_v11 = vrot.slane %v6076_v21, %v5606_v15  ;;  %v2473_v52 = vrot.slane %v6076_v21, %v5609_v0 }
 0x309   :  { %v3919_v24 = vcombine.low %v3911_v58, %v3918_v63  ;;  %v3364_v61 = vcombine.low %v3342_v44, %v3349_v10  ;;  %v2477_v9 = vrot.slane %v6076_v21, %v5612_v34  ;;  %v2481_v53 = vrot.slane %v6076_v21, %v5615_v54 }
 0x30a   :  { %v3365_v47 = vcombine.low %v3356_v17, %v3363_v45  ;;  %v2485_v26 = vrot.slane %v6076_v21, %v5618_v16  ;;  %v3920_v60 = vcombine.low %v2457_v41, %v2461_v42  ;;  %v3921_v49 = vcombine.low %v2465_v23, %v2469_v11  ;;  %v1555_v23 = vpop.xlane.xlu1 %1554 }
 0x30b   :  { %4290 = vperm.xlu1 %4603, %v3919_v24   ;;  %v3372_v46 = vrot.slane %v3364_v61, %v5622_v28  ;;  %v3922_v40 = vcombine.low %v2473_v52, %v2477_v9  ;;  %v6199_v51 = vadd.f32 %v5600_v62, %v1552_v43  ;;  %v2105_v29 = vrot.slane %v5865_v37, %v6520_v30 }
 0x30c   :  { %v3379_v19 = vrot.slane %v3365_v47, %v5622_v28  ;;  %v3923_v14 = vcombine.low %v2481_v53, %v2485_v26  ;;  %v3930_v12 = vrot.slane %v3920_v60, %v5622_v28  ;;  %v3937_v36 = vrot.slane %v3921_v49, %v5622_v28 }
 0x30d   :  { %v3944_v21 = vrot.slane %v3922_v40, %v5622_v28  ;;  %v2109_v31 = vrot.slane %v5865_v37, %v6521_v57  ;;  %v2113_v13 = vrot.slane %v5865_v37, %v5603_v56  ;;  %v2117_v32 = vrot.slane %v5865_v37, %v5606_v15 }
 0x30e   :  { %v3380_v1 = vcombine.low %v3372_v46, %v3379_v19  ;;  %v3951_v8 = vrot.slane %v3923_v14, %v5622_v28  ;;  %v3952_v33 = vcombine.low %v3930_v12, %v3937_v36  ;;  %v2121_v48 = vrot.slane %v5865_v37, %v5609_v0 }
 0x30f   :  { %v2125_v35 = vrot.slane %v5865_v37, %v5612_v34  ;;  %v2129_v27 = vrot.slane %v5865_v37, %v5615_v54  ;;  %v2133_v38 = vrot.slane %v5865_v37, %v5618_v16  ;;  %v3381_v5 = vcombine.low %v2105_v29, %v2109_v31 }
 0x310   :  { %4257 = vperm.xlu1 %4603, %v3380_v1   ;;  %v3953_v22 = vcombine.low %v3944_v21, %v3951_v8  ;;  %v3960_v18 = vrot.slane %v3952_v33, %v5622_v28  ;;  %v3382_v20 = vcombine.low %v2113_v13, %v2117_v32  ;;  %v2489_v39 = vrot.slane %v6102_v4, %v6520_v30 }
 0x311   :  { %v3383_v55 = vcombine.low %v2121_v48, %v2125_v35  ;;  %v3384_v6 = vcombine.low %v2129_v27, %v2133_v38  ;;  %v3391_v59 = vrot.slane %v3381_v5, %v5622_v28  ;;  %v2493_v41 = vrot.slane %v6102_v4, %v6521_v57 }
 0x312   :  { %v3967_v58 = vrot.slane %v3953_v22, %v5622_v28  ;;  %v3398_v37 = vrot.slane %v3382_v20, %v5622_v28  ;;  %v2497_v7 = vrot.slane %v6102_v4, %v5603_v56  ;;  %v2501_v3 = vrot.slane %v6102_v4, %v5606_v15 }
 0x313   :  { %v3405_v42 = vrot.slane %v3383_v55, %v5622_v28  ;;  %v3412_v63 = vrot.slane %v3384_v6, %v5622_v28  ;;  %v2505_v44 = vrot.slane %v6102_v4, %v5609_v0  ;;  %v2509_v10 = vrot.slane %v6102_v4, %v5612_v34 }
 0x314   :  { %v3968_v17 = vcombine.low %v3960_v18, %v3967_v58  ;;  %v3413_v45 = vcombine.low %v3391_v59, %v3398_v37  ;;  %v2513_v11 = vrot.slane %v6102_v4, %v5615_v54  ;;  %v2517_v52 = vrot.slane %v6102_v4, %v5618_v16 }
 0x315   :  { %v3414_v43 = vcombine.low %v3405_v42, %v3412_v63  ;;  %v3969_v24 = vcombine.low %v2489_v39, %v2493_v41  ;;  %v3970_v61 = vcombine.low %v2497_v7, %v2501_v3  ;;  %v3971_v9 = vcombine.low %v2505_v44, %v2509_v10 }
 0x316   :  { %4293 = vperm.xlu0 %4602, %v3968_v17   ;;  %v3421_v53 = vrot.slane %v3413_v45, %v5622_v28  ;;  %v3972_v47 = vcombine.low %v2513_v11, %v2517_v52  ;;  %v6246_v26 = vadd.f32 %v5600_v62, %v1555_v23  ;;  %v2521_v60 = vrot.slane %v6126_v25, %v6520_v30 }
 0x317   :  { %v3428_v49 = vrot.slane %v3414_v43, %v5622_v28  ;;  %v3979_v46 = vrot.slane %v3969_v24, %v5622_v28  ;;  %v3986_v4 = vrot.slane %v3970_v61, %v5622_v28  ;;  %v3993_v40 = vrot.slane %v3971_v9, %v5622_v28 }
 0x318   :  { %v4000_v29 = vrot.slane %v3972_v47, %v5622_v28  ;;  %v2525_v19 = vrot.slane %v6126_v25, %v6521_v57  ;;  %v2529_v62 = vrot.slane %v6126_v25, %v5603_v56  ;;  %v2533_v14 = vrot.slane %v6126_v25, %v5606_v15 }
 0x319   :  { %v3429_v12 = vcombine.low %v3421_v53, %v3428_v49  ;;  %v4001_v36 = vcombine.low %v3979_v46, %v3986_v4  ;;  %v2537_v21 = vrot.slane %v6126_v25, %v5609_v0  ;;  %v2541_v31 = vrot.slane %v6126_v25, %v5612_v34 }
 0x31a   :  { %v4002_v13 = vcombine.low %v3993_v40, %v4000_v29  ;;  %v2545_v32 = vrot.slane %v6126_v25, %v5615_v54  ;;  %v2549_v1 = vrot.slane %v6126_v25, %v5618_v16  ;;  %v4018_v8 = vcombine.low %v2521_v60, %v2525_v19 }
 0x31b   :  { %4260 = vperm.xlu1 %4603, %v3429_v12   ;;  %v4009_v33 = vrot.slane %v4001_v36, %v5622_v28  ;;  %v4019_v48 = vcombine.low %v2529_v62, %v2533_v14  ;;  %v4020_v35 = vcombine.low %v2537_v21, %v2541_v31  ;;  %v2553_v27 = vrot.slane %v6152_v2, %v6520_v30 }
 0x31c   :  { %v4016_v38 = vrot.slane %v4002_v13, %v5622_v28  ;;  %v4021_v5 = vcombine.low %v2545_v32, %v2549_v1  ;;  %v4028_v22 = vrot.slane %v4018_v8, %v5622_v28  ;;  %v2557_v18 = vrot.slane %v6152_v2, %v6521_v57 }
 0x31d   :  { %v4035_v20 = vrot.slane %v4019_v48, %v5622_v28  ;;  %v4042_v25 = vrot.slane %v4020_v35, %v5622_v28  ;;  %v2561_v39 = vrot.slane %v6152_v2, %v5603_v56  ;;  %v2565_v55 = vrot.slane %v6152_v2, %v5606_v15 }
 0x31e   :  { %v4017_v6 = vcombine.low %v4009_v33, %v4016_v38  ;;  %v4049_v59 = vrot.slane %v4021_v5, %v5622_v28  ;;  %v2569_v41 = vrot.slane %v6152_v2, %v5609_v0  ;;  %v2573_v58 = vrot.slane %v6152_v2, %v5612_v34 }
 0x31f   :  { %v4050_v37 = vcombine.low %v4028_v22, %v4035_v20  ;;  %v2577_v7 = vrot.slane %v6152_v2, %v5615_v54  ;;  %v2581_v3 = vrot.slane %v6152_v2, %v5618_v16  ;;  %v4067_v42 = vcombine.low %v2553_v27, %v2557_v18 }
 0x320   :  { %4296 = vperm.xlu0 %4602, %v4017_v6   ;;  %v4051_v63 = vcombine.low %v4042_v25, %v4049_v59  ;;  %v4068_v44 = vcombine.low %v2561_v39, %v2565_v55  ;;  %v4069_v10 = vcombine.low %v2569_v41, %v2573_v58  ;;  %v2585_v23 = vrot.slane %v6199_v51, %v6520_v30 }
 0x321   :  { %v4058_v17 = vrot.slane %v4050_v37, %v5622_v28  ;;  %v4070_v45 = vcombine.low %v2577_v7, %v2581_v3  ;;  %v4077_v11 = vrot.slane %v4067_v42, %v5622_v28  ;;  %v2589_v52 = vrot.slane %v6199_v51, %v6521_v57  ;;  %v4219_v37 = vpop.permute.xlu1 %4218 }
 0x322   :  { %v4065_v43 = vrot.slane %v4051_v63, %v5622_v28  ;;  %v4084_v2 = vrot.slane %v4068_v44, %v5622_v28  ;;  %v4091_v24 = vrot.slane %v4069_v10, %v5622_v28  ;;  %v2593_v61 = vrot.slane %v6199_v51, %v5603_v56 }
 0x323   :  { %v4098_v9 = vrot.slane %v4070_v45, %v5622_v28  ;;  %v2597_v53 = vrot.slane %v6199_v51, %v5606_v15  ;;  %v2601_v47 = vrot.slane %v6199_v51, %v5609_v0  ;;  %v2605_v60 = vrot.slane %v6199_v51, %v5612_v34 }
 0x324   :  { %v4066_v49 = vcombine.low %v4058_v17, %v4065_v43  ;;  %v4099_v46 = vcombine.low %v4077_v11, %v4084_v2  ;;  %v2609_v4 = vrot.slane %v6199_v51, %v5615_v54  ;;  %v2613_v40 = vrot.slane %v6199_v51, %v5618_v16  ;;  %v4216_v17 = vpop.permute.xlu0 %4215 }
 0x325   :  { %v4100_v29 = vcombine.low %v4091_v24, %v4098_v9  ;;  %v4116_v19 = vcombine.low %v2585_v23, %v2589_v52  ;;  %v4117_v62 = vcombine.low %v2593_v61, %v2597_v53  ;;  %v4118_v14 = vcombine.low %v2601_v47, %v2605_v60  ;;  %v4222_v7 = vpop.permute.xlu1 %4221 }
 0x326   :  { %4299 = vperm.xlu0 %4602, %v4066_v49   ;;  %v4107_v12 = vrot.slane %v4099_v46, %v5622_v28  ;;  %v4119_v36 = vcombine.low %v2609_v4, %v2613_v40  ;;  %v2617_v21 = vrot.slane %v6246_v26, %v6520_v30  ;;  %v2621_v8 = vrot.slane %v6246_v26, %v6521_v57 }
 0x327   :  { %v4114_v31 = vrot.slane %v4100_v29, %v5622_v28  ;;  %v4126_v13 = vrot.slane %v4116_v19, %v5622_v28  ;;  %v4133_v32 = vrot.slane %v4117_v62, %v5622_v28  ;;  %v4140_v1 = vrot.slane %v4118_v14, %v5622_v28 }
 0x328   :  { %v4147_v51 = vrot.slane %v4119_v36, %v5622_v28  ;;  %v2625_v33 = vrot.slane %v6246_v26, %v5603_v56  ;;  %v2629_v30 = vrot.slane %v6246_v26, %v5606_v15  ;;  %v2633_v27 = vrot.slane %v6246_v26, %v5609_v0 }
 0x329   :  { %v4115_v48 = vcombine.low %v4107_v12, %v4114_v31  ;;  %v4148_v35 = vcombine.low %v4126_v13, %v4133_v32  ;;  %v2637_v5 = vrot.slane %v6246_v26, %v5612_v34  ;;  %v2641_v22 = vrot.slane %v6246_v26, %v5615_v54  ;;  %v4225_v3 = vpop.permute.xlu1 %4224 }
 0x32a   :  { %v4149_v38 = vcombine.low %v4140_v1, %v4147_v51  ;;  %v2645_v56 = vrot.slane %v6246_v26, %v5618_v16  ;;  %v4165_v18 = vcombine.low %v2617_v21, %v2621_v8  ;;  %v4166_v20 = vcombine.low %v2625_v33, %v2629_v30 }
 0x32b   :  { %4302 = vperm.xlu0 %4602, %v4115_v48   ;;  %v4156_v57 = vrot.slane %v4148_v35, %v5622_v28  ;;  %v4167_v25 = vcombine.low %v2633_v27, %v2637_v5  ;;  %v6523_v47 = vlaneseq }
 0x32c   :  { %v4163_v15 = vrot.slane %v4149_v38, %v5622_v28  ;;  %v4168_v39 = vcombine.low %v2641_v22, %v2645_v56  ;;  %v4175_v0 = vrot.slane %v4165_v18, %v5622_v28  ;;  %v4182_v55 = vrot.slane %v4166_v20, %v5622_v28 }
 0x32d   :  { %v4189_v6 = vrot.slane %v4167_v25, %v5622_v28  ;;  %v4228_v42 = vpop.permute.xlu1 %4227  ;;  %v6370_v60 = vand.u32 127, %v6523_v47  ;;  %vm4518_vm2 = vcmp.lt.s32.totalorder %v6523_v47, 256 }
 0x32e   :  { %v4164_v34 = vcombine.low %v4156_v57, %v4163_v15  ;;  %v4196_v54 = vrot.slane %v4168_v39, %v5622_v28  ;;  %v4197_v59 = vcombine.low %v4175_v0, %v4182_v55 }
 0x32f   :  { %v4316_v4 = vadd.s32 4294967288, %v6370_v60  ;;  %v4323_v40 = vadd.s32 4294967280, %v6370_v60  ;;  %v4330_v29 = vadd.s32 4294967272, %v6370_v60  ;;  %v4337_v62 = vadd.s32 4294967264, %v6370_v60 }
 0x330   :  { %4305 = vperm.xlu0 %4602, %v4164_v34   ;;  %v4198_v41 = vcombine.low %v4189_v6, %v4196_v54  ;;  %v4205_v16 = vrot.slane %v4197_v59, %v5622_v28  ;;  %v4344_v36 = vadd.s32 4294967256, %v6370_v60  ;;  %v4351_v31 = vadd.s32 4294967248, %v6370_v60 }
 0x331   :  { %v6343_v63 = vpop.permute.xlu1 %4230  ;;  %v4319_v12 = vsub.s32 %v4316_v4, %v6522_v50  ;;  %v4326_v21 = vsub.s32 %v4323_v40, %v6522_v50  ;;  %v4314_v13 = vsub.s32 %v6370_v60, %v6522_v50  ;;  %v6391_v32 = vsub.s32 %v4330_v29, %v6522_v50 }
 0x332   :  { %v4212_v26 = vrot.slane %v4198_v41, %v5622_v28  ;;  %v4358_v1 = vadd.s32 4294967240, %v6370_v60  ;;  %v6395_v51 = vsub.s32 %v4337_v62, %v6522_v50  ;;  %v6400_v48 = vsub.s32 %v4344_v36, %v6522_v50 }
 0x333   :  { %v4320_v33 = vrot.slane %v4219_v37, %v4319_v12  ;;  %v4327_v30 = vrot.slane %v4222_v7, %v4326_v21  ;;  %v6405_v27 = vsub.s32 %v4351_v31, %v6522_v50  ;;  %v4315_v38 = vrot.slane %v4216_v17, %v4314_v13 }
 0x334   :  { %v4213_v58 = vcombine.low %v4205_v16, %v4212_v26  ;;  %v4334_v5 = vrot.slane %v4225_v3, %v6391_v32  ;;  %v6409_v22 = vsub.s32 %v4358_v1, %v6522_v50  ;;  %v4341_v57 = vrot.slane %v4228_v42, %v6395_v51 }
 0x335   :  { %v6345_v44 = vpop.permute.xlu1 %4233  ;;  %v4365_v56 = vadd.s32 4294967232, %v6370_v60  ;;  %v4322_v20 = vsel %vm4321_vm3, %v4320_v33, %v4315_v38  ;;  %v4348_v15 = vrot.slane %v6343_v63, %v6400_v48  ;;  %v4372_v0 = vadd.s32 4294967224, %v6370_v60 }
 0x336   :  { %4308 = vperm.xlu0 %4602, %v4213_v58   ;;  %v4329_v25 = vsel %vm4328_vm4, %v4327_v30, %v4322_v20  ;;  %v4355_v39 = vrot.slane %v6345_v44, %v6405_v27  ;;  %v4379_v41 = vadd.s32 4294967216, %v6370_v60  ;;  %v4386_v63 = vadd.s32 4294967208, %v6370_v60 }
 0x337   :  { %v4336_v55 = vsel %vm4335_vm5, %v4334_v5, %v4329_v25  ;;  %v4368_v59 = vsub.s32 %v4365_v56, %v6522_v50  ;;  %v4375_v7 = vsub.s32 %v4372_v0, %v6522_v50  ;;  %v4393_v4 = vadd.s32 4294967200, %v6370_v60 }
 0x338   :  { %v6353_v11 = vpop.permute.xlu0 %4242  ;;  %v4343_v54 = vsel %vm4342_vm6, %v4341_v57, %v4336_v55  ;;  %v4400_v29 = vadd.s32 4294967192, %v6370_v60  ;;  %v4407_v36 = vadd.s32 4294967184, %v6370_v60 }
 0x339   :  { %v6347_v10 = vpop.permute.xlu1 %4236  ;;  %v4350_v26 = vsel %vm4349_vm7, %v4348_v15, %v4343_v54  ;;  %v4396_v1 = vsub.s32 %v4393_v4, %v6522_v50 }
 0x33a   :  { %v4362_v34 = vrot.slane %v6347_v10, %v6409_v22  ;;  %v4357_v37 = vsel %vm4356_vm8, %v4355_v39, %v4350_v26 }
 0x33c   :  { %v4364_v42 = vsel %vm4363_vm9, %v4362_v34, %v4357_v37 }
 0x33d   :  { %v6349_v23 = vpop.permute.xlu1 %4239 }
 0x33e   :  { %v4369_v17 = vrot.slane %v6349_v23, %v4368_v59 }
 0x341   :  { %v6351_v45 = vpop.permute.xlu1 %4245 }
 0x345   :  { %v6357_v43 = vpop.permute.xlu1 %4248 }
 0x349   :  { %v6361_v24 = vpop.permute.xlu1 %4251 }
 0x34e   :  { %v6367_v53 = vpop.permute.xlu1 %4254 }
 0x355   :  { %v6355_v52 = vpop.permute.xlu0 %4263 }
 0x356   :  { %v4424_v44 = vrot.slane %v6355_v52, %v4314_v13 }
 0x35a   :  { %v6374_v46 = vpop.permute.xlu1 %4266 }
 0x35b   :  { %v4428_v58 = vrot.slane %v6374_v46, %v4319_v12  ;;  %v4382_v46 = vsub.s32 %v4379_v41, %v6522_v50 }
 0x35d   :  { %v4429_v62 = vsel %vm4321_vm3, %v4428_v58, %v4424_v44  ;;  %v4383_v30 = vrot.slane %v6351_v45, %v4382_v46 }
 0x35f   :  { %v6359_v2 = vpop.permute.xlu0 %4269 }
 0x360   :  { %v4433_v3 = vrot.slane %v6359_v2, %v4326_v21 }
 0x362   :  { %v4434_v23 = vsel %vm4328_vm4, %v4433_v3, %v4429_v62 }
 0x365   :  { %v6382_v14 = vpop.permute.xlu1 %4272 }
 0x366   :  { %v4438_v10 = vrot.slane %v6382_v14, %v6391_v32  ;;  %v4376_v14 = vrot.slane %v6353_v11, %v4375_v7  ;;  %v4414_v32 = vadd.s32 4294967176, %v6370_v60  ;;  %v4410_v60 = vsub.s32 %v4407_v36, %v6522_v50 }
 0x368   :  { %v4439_v31 = vsel %vm4335_vm5, %v4438_v10, %v4434_v23  ;;  %v4417_v57 = vsub.s32 %v4414_v32, %v6522_v50 }
 0x36a   :  { %v6363_v61 = vpop.permute.xlu0 %4275 }
 0x36b   :  { %v4443_v40 = vrot.slane %v6363_v61, %v6395_v51  ;;  %v4389_v61 = vsub.s32 %v4386_v63, %v6522_v50 }
 0x36d   :  { %v4444_v11 = vsel %vm4342_vm6, %v4443_v40, %v4439_v31 }
 0x370   :  { %v6397_v8 = vpop.permute.xlu1 %4278 }
 0x371   :  { %v4448_v52 = vrot.slane %v6397_v8, %v6400_v48  ;;  %v4403_v8 = vsub.s32 %v4400_v29, %v6522_v50 }
 0x373   :  { %v4449_v33 = vsel %vm4349_vm7, %v4448_v52, %v4444_v11 }
 0x375   :  { %v6365_v9 = vpop.permute.xlu0 %4281 }
 0x376   :  { %v4453_v12 = vrot.slane %v6365_v9, %v6405_v27  ;;  %v4371_v9 = vsel %vm4370_vm10, %v4369_v17, %v4364_v42 }
 0x377   :  { %v4378_v25 = vsel %vm4377_vm11, %v4376_v14, %v4371_v9 }
 0x378   :  { %v4454_v27 = vsel %vm4356_vm8, %v4453_v12, %v4449_v33  ;;  %v4385_v0 = vsel %vm4384_vm12, %v4383_v30, %v4378_v25 }
 0x37b   :  { %v6413_v18 = vpop.permute.xlu1 %4284 }
 0x37c   :  { %v4458_v13 = vrot.slane %v6413_v18, %v6409_v22  ;;  %v4390_v22 = vrot.slane %v6357_v43, %v4389_v61  ;;  %v4397_v18 = vrot.slane %v6361_v24, %v4396_v1 }
 0x37e   :  { %v4392_v24 = vsel %vm4391_vm13, %v4390_v22, %v4385_v0 }
 0x380   :  { %v6372_v49 = vpop.permute.xlu0 %4287 }
 0x381   :  { %v4463_v51 = vrot.slane %v6372_v49, %v4368_v59  ;;  %v4459_v49 = vsel %vm4363_vm9, %v4458_v13, %v4454_v27 }
 0x383   :  { %v4464_v45 = vsel %vm4370_vm10, %v4463_v51, %v4459_v49 }
 0x386   :  { %v4291_v16 = vpop.permute.xlu1 %4290 }
 0x387   :  { %v4468_v48 = vrot.slane %v4291_v16, %v4375_v7 }
 0x389   :  { %v4469_v43 = vsel %vm4377_vm11, %v4468_v48, %v4464_v45 }
 0x38b   :  { %v4258_v21 = vpop.permute.xlu1 %4257 }
 0x38c   :  { %v4411_v50 = vrot.slane %v4258_v21, %v4410_v60 }
 0x391   :  { %v6379_v19 = vpop.permute.xlu0 %4293 }
 0x392   :  { %v4473_v38 = vrot.slane %v6379_v19, %v4382_v46  ;;  %v4404_v19 = vrot.slane %v6367_v53, %v4403_v8 }
 0x396   :  { %v4261_v20 = vpop.permute.xlu1 %4260 }
 0x397   :  { %v4418_v34 = vrot.slane %v4261_v20, %v4417_v57 }
 0x39b   :  { %v6402_v35 = vpop.permute.xlu0 %4296 }
 0x39c   :  { %v4478_v56 = vrot.slane %v6402_v35, %v4389_v61  ;;  %v4474_v35 = vsel %vm4384_vm12, %v4473_v38, %v4469_v43 }
 0x39e   :  { %v4479_v54 = vsel %vm4391_vm13, %v4478_v56, %v4474_v35 }
 0x3a1   :  { %v6425_v6 = vpop.permute.xlu0 %4299 }
 0x3a2   :  { %v4483_v15 = vrot.slane %v6425_v6, %v4396_v1  ;;  %v4399_v6 = vsel %vm4398_vm14, %v4397_v18, %v4392_v24 }
 0x3a3   :  { %v4406_v41 = vsel %vm4405_vm15, %v4404_v19, %v4399_v6 }
 0x3a4   :  { %v4484_v53 = vsel %vm4398_vm14, %v4483_v15, %v4479_v54  ;;  %v4413_v58 = vsel %vm4412_vm0, %v4411_v50, %v4406_v41 }
 0x3a5   :  { %v4420_v7 = vsel %vm4419_vm1, %v4418_v34, %v4413_v58 }
 0x3a6   :  { %v4303_v2 = vpop.permute.xlu0 %4302 }
 0x3a7   :  { %v4488_v39 = vrot.slane %v4303_v2, %v4403_v8 }
 0x3a9   :  { %v4489_v16 = vsel %vm4405_vm15, %v4488_v39, %v4484_v53 }
 0x3ab   :  { %v4306_v5 = vpop.permute.xlu0 %4305 }
 0x3ac   :  { %v4493_v55 = vrot.slane %v4306_v5, %v4410_v60 }
 0x3ae   :  { %v4494_v37 = vsel %vm4412_vm0, %v4493_v55, %v4489_v16 }
 0x3b1   :  { %v4309_v59 = vpop.permute.xlu0 %4308 }
 0x3b2   :  { %v4498_v26 = vrot.slane %v4309_v59, %v4417_v57 }
 0x3b4   :  { %v4499_v3 = vsel %vm4419_vm1, %v4498_v26, %v4494_v37 }
 0x3b5   :  { %v4500_v42 = vcombine.low %v4420_v7, %v4499_v3 }
 0x3b7   :  { %v4507_v63 = vrot.slane %v4500_v42, %v5622_v28 }
 0x3b9   :  { %v4514_v44 = vrot.slane %v4507_v63, %v5622_v28 }
 0x3bb   :  { %4520 = vst.msk [vmem:[%s6502_s9] sm:$0x3] %vm4518_vm2, %v4514_v44 }
 0x3bc   :  { %4525 = vsyncpa [#allocation4], 1 }
 0x3bd   :  { %4526 = vsyncpa [#allocation6], 1 }

</bundles_post_ra>
